<compile_context>
chip_gen: v7x
topology: tpu7x:2x2x1
jax: 0.10.0
libtpu: 0.0.40
codegen_flags: <defaults>
</compile_context>

<pallas_src>
import jax
import jax.numpy as jnp
import numpy as np
from jax import lax
from jax.experimental import pallas as pl
from jax.experimental.pallas import tpu as pltpu


def _round_up(n, m):
    return ((n + m - 1) // m) * m


def _pad2(a, rows, cols):
    return jnp.pad(a, ((0, rows - a.shape[0]), (0, cols - a.shape[1])))


def rnn_fc_kernel(xp_ref, wih0t_ref, whh0t_ref, b0_ref,
                  w1cat_ref, b1_ref, wfc_ref, bfc_ref,
                  out_ref, xpre_ref):
    """Whole 2-layer tanh RNN recurrence + fused FC in one invocation."""
    Bp = out_ref.shape[0]
    Hp = whh0t_ref.shape[1]
    T = wfc_ref.shape[0]

    # Hoisted layer-0 input projection for ALL timesteps: one big MXU matmul.
    #   xpre[t*Bp + b, :] = x[t, b, :] @ W_ih0^T + (b_ih0 + b_hh0)
    xpre_ref[...] = (
        jnp.dot(xp_ref[...], wih0t_ref[...],
                preferred_element_type=jnp.float32)
        + b0_ref[...])

    def step(t, carry):
        h1, h2, acc = carry
        row = pl.multiple_of(t * Bp, Bp)
        xpre_t = xpre_ref[pl.ds(row, Bp), :]                        # (Bp, Hp)

        # Layer 0: h1_t = tanh(x_pre_t + h1_{t-1} @ W_hh0^T)
        h1 = jnp.tanh(
            xpre_t + jnp.dot(h1, whh0t_ref[...],
                             preferred_element_type=jnp.float32))

        # Layer 1 (fused ih/hh matmuls):
        #   h2_t = tanh(b1 + [h1_t | h2_{t-1}] @ [W_ih1 ; W_hh1]^T)
        hcat = jnp.concatenate([h1, h2], axis=-1)                   # (Bp, 2Hp)
        h2 = jnp.tanh(
            b1_ref[...] + jnp.dot(hcat, w1cat_ref[...],
                                  preferred_element_type=jnp.float32))

        # Fused final Linear: logits += h2_t @ W_fc[:, t*H:(t+1)*H]^T
        acc = acc + jnp.dot(h2, wfc_ref[t],
                            preferred_element_type=jnp.float32)
        return h1, h2, acc

    zeros = jnp.zeros((Bp, Hp), jnp.float32)          # h0 = 0 (both layers)
    acc0 = jnp.zeros(out_ref.shape, jnp.float32)
    _, _, acc = lax.fori_loop(0, T, step, (zeros, zeros, acc0), unroll=True)

    # Single lane-dense store of the logits (+ FC bias).
    out_ref[...] = acc + bfc_ref[...]


def rnn_forward(x, params):
    """x: (B, T, I) float32 -> logits (B, C) float32."""
    B, T, I = x.shape
    H = params["w_hh0"].shape[0]
    C = params["w_fc"].shape[0]

    # Pad to f32 hardware tiles: sublane (8) on batch, lane (128) on I/H/C.
    Bp = _round_up(B, 8)
    Ip = _round_up(I, 128)
    Hp = _round_up(H, 128)
    Cp = _round_up(C, 128)

    # Time-major, padded, flattened input: (T*Bp, Ip).
    x_tbi = jnp.transpose(x, (1, 0, 2))
    x_p = jnp.pad(x_tbi, ((0, 0), (0, Bp - B), (0, Ip - I))).reshape(T * Bp, Ip)

    # Pre-transposed / pre-combined weights (one-time XLA work in the wrapper).
    wih0t = _pad2(params["w_ih0"].T, Ip, Hp)                        # (Ip, Hp)
    whh0t = _pad2(params["w_hh0"].T, Hp, Hp)                        # (Hp, Hp)
    b0 = jnp.pad(params["b_ih0"] + params["b_hh0"], (0, Hp - H)).reshape(1, Hp)

    w1cat = jnp.concatenate(
        [_pad2(params["w_ih1"].T, Hp, Hp),
         _pad2(params["w_hh1"].T, Hp, Hp)], axis=0)                 # (2Hp, Hp)
    b1 = jnp.pad(params["b_ih1"] + params["b_hh1"], (0, Hp - H)).reshape(1, Hp)

    # FC weight (C, T*H) -> per-timestep, pre-transposed (T, Hp, Cp).
    wfc = params["w_fc"].reshape(C, T, H).transpose(1, 2, 0)        # (T, H, C)
    wfc = jnp.pad(wfc, ((0, 0), (0, Hp - H), (0, Cp - C)))
    bfc = jnp.pad(params["b_fc"], (0, Cp - C)).reshape(1, Cp)

    # Explicit VMEM budget (inputs + output + xpre scratch) with headroom,
    # capped below the smallest per-core VMEM (64 MiB on v7x).
    n_f32 = (x_p.size + wih0t.size + whh0t.size + b0.size + w1cat.size
             + b1.size + wfc.size + bfc.size + Bp * Cp + T * Bp * Hp)
    vmem_limit = int(min(56 * 1024 * 1024,
                         max(16 * 1024 * 1024, 2 * 4 * n_f32)))

    out = pl.pallas_call(
        rnn_fc_kernel,
        out_shape=jax.ShapeDtypeStruct((Bp, Cp), jnp.float32),
        in_specs=[pl.BlockSpec(memory_space=pltpu.MemorySpace.VMEM)] * 8,
        out_specs=pl.BlockSpec(memory_space=pltpu.MemorySpace.VMEM),
        scratch_shapes=[pltpu.VMEM((T * Bp, Hp), jnp.float32)],
        compiler_params=pltpu.CompilerParams(vmem_limit_bytes=vmem_limit),
    )(x_p, wih0t, whh0t, b0, w1cat, b1, wfc, bfc)

    return out[:B, :C]


def rnn_reference(x, params):
    """Pure-JAX reference matching torch.nn.RNN(tanh) + Linear semantics."""
    B, T, _ = x.shape
    H = params["w_hh0"].shape[0]
    h1 = jnp.zeros((B, H), jnp.float32)
    h2 = jnp.zeros((B, H), jnp.float32)
    outs = []
    for t in range(T):
        h1 = jnp.tanh(x[:, t] @ params["w_ih0"].T + params["b_ih0"]
                      + h1 @ params["w_hh0"].T + params["b_hh0"])
        h2 = jnp.tanh(h1 @ params["w_ih1"].T + params["b_ih1"]
                      + h2 @ params["w_hh1"].T + params["b_hh1"])
        outs.append(h2)
    flat = jnp.stack(outs, axis=1).reshape(B, -1)
    return flat @ params["w_fc"].T + params["b_fc"]


def init_params(key, input_size, hidden_size, seq_len, num_classes):
    """Deterministic init mimicking PyTorch's U(-1/sqrt(H), 1/sqrt(H))."""
    bound = 1.0 / np.sqrt(hidden_size)
    keys = jax.random.split(key, 10)

    def u(k, shape):
        return jax.random.uniform(k, shape, jnp.float32, -bound, bound)

    return {
        "w_ih0": u(keys[0], (hidden_size, input_size)),
        "w_hh0": u(keys[1], (hidden_size, hidden_size)),
        "b_ih0": u(keys[2], (hidden_size,)),
        "b_hh0": u(keys[3], (hidden_size,)),
        "w_ih1": u(keys[4], (hidden_size, hidden_size)),
        "w_hh1": u(keys[5], (hidden_size, hidden_size)),
        "b_ih1": u(keys[6], (hidden_size,)),
        "b_hh1": u(keys[7], (hidden_size,)),
        "w_fc":  u(keys[8], (num_classes, hidden_size * seq_len)),
        "b_fc":  u(keys[9], (num_classes,)),
    }


if __name__ == "__main__":
    # Small shapes consistent with the module's forward (batch_first RNN + FC).
    B, T, I, H, C = 2, 8, 8, 32, 10

    key = jax.random.PRNGKey(0)
    k_x, k_p = jax.random.split(key)
    x = jax.random.normal(k_x, (B, T, I), dtype=jnp.float32)
    params = init_params(k_p, I, H, T, C)

    logits = jax.block_until_ready(rnn_forward(x, params))
    ref = jax.block_until_ready(rnn_reference(x, params))

    np.testing.assert_allclose(np.asarray(logits), np.asarray(ref),
                               rtol=1e-4, atol=1e-4)
    assert logits.shape == (B, C)
    print("KERNEL_OK")
</pallas_src>

<mosaic_0001>
module attributes {stable_mosaic.version = 11 : i64} {
  func.func @rnn_fc_kernel(%arg0: memref<64x128xf32, #tpu.memory_space<vmem>>, %arg1: memref<128x128xf32, #tpu.memory_space<vmem>>, %arg2: memref<128x128xf32, #tpu.memory_space<vmem>>, %arg3: memref<1x128xf32, #tpu.memory_space<vmem>>, %arg4: memref<256x128xf32, #tpu.memory_space<vmem>>, %arg5: memref<1x128xf32, #tpu.memory_space<vmem>>, %arg6: memref<8x128x128xf32, #tpu.memory_space<vmem>>, %arg7: memref<1x128xf32, #tpu.memory_space<vmem>>, %arg8: memref<8x128xf32, #tpu.memory_space<vmem>>, %arg9: memref<64x128xf32, #tpu.memory_space<vmem>>) attributes {dimension_semantics = [], scalar_prefetch = 0 : i64, scratch_operands = 1 : i64, tpu.core_type = #tpu.core_type<tc>} {
    %c0 = arith.constant 0 : index
    %c0_0 = arith.constant 0 : index
    %0 = vector.load %arg0[%c0, %c0_0] : memref<64x128xf32, #tpu.memory_space<vmem>>, vector<64x128xf32>
    %c0_1 = arith.constant 0 : index
    %c0_2 = arith.constant 0 : index
    %1 = vector.load %arg1[%c0_1, %c0_2] : memref<128x128xf32, #tpu.memory_space<vmem>>, vector<128x128xf32>
    %cst = arith.constant dense<0.000000e+00> : vector<64x128xf32>
    %2 = tpu.matmul %0, %1, %cst {dimension_numbers = #tpu.dot_dimension_numbers<[1], [0], [0], [1], [0, 0, 1, 1], [], []>} : vector<64x128xf32>, vector<128x128xf32>, vector<64x128xf32> -> vector<64x128xf32>
    %c0_3 = arith.constant 0 : index
    %c0_4 = arith.constant 0 : index
    %3 = vector.load %arg3[%c0_3, %c0_4] : memref<1x128xf32, #tpu.memory_space<vmem>>, vector<1x128xf32>
    %4 = vector.broadcast %3 : vector<1x128xf32> to vector<64x128xf32>
    %5 = arith.addf %2, %4 : vector<64x128xf32>
    %c0_5 = arith.constant 0 : index
    %c0_6 = arith.constant 0 : index
    %6 = vector.load %arg9[%c0_5, %c0_6] : memref<64x128xf32, #tpu.memory_space<vmem>>, vector<64x128xf32>
    tpu.vector_store %arg9[%c0_5, %c0_6], %5 {strides = array<i32>} : memref<64x128xf32, #tpu.memory_space<vmem>>, vector<64x128xf32>,
    %cst_7 = arith.constant 0.000000e+00 : f32
    %7 = vector.broadcast %cst_7 : f32 to vector<8x128xf32>
    %cst_8 = arith.constant 0.000000e+00 : f32
    %8 = vector.broadcast %cst_8 : f32 to vector<8x128xf32>
    %c0_i32 = arith.constant 0 : i32
    %c8_i32 = arith.constant 8 : i32
    %9 = arith.muli %c0_i32, %c8_i32 : i32
    %10 = tpu.assume_multiple %9, 8 : i32
    %11 = arith.index_cast %10 : i32 to index
    %c0_9 = arith.constant 0 : index
    %12 = vector.load %arg9[%11, %c0_9] : memref<64x128xf32, #tpu.memory_space<vmem>>, vector<8x128xf32>
    %c0_10 = arith.constant 0 : index
    %c0_11 = arith.constant 0 : index
    %13 = vector.load %arg2[%c0_10, %c0_11] : memref<128x128xf32, #tpu.memory_space<vmem>>, vector<128x128xf32>
    %cst_12 = arith.constant dense<0.000000e+00> : vector<8x128xf32>
    %14 = tpu.matmul %7, %13, %cst_12 {dimension_numbers = #tpu.dot_dimension_numbers<[1], [0], [0], [1], [0, 0, 1, 1], [], []>} : vector<8x128xf32>, vector<128x128xf32>, vector<8x128xf32> -> vector<8x128xf32>
    %15 = arith.addf %12, %14 : vector<8x128xf32>
    %16 = math.tanh %15 : vector<8x128xf32>
    %17 = tpu.concatenate %16, %7 in 1 : vector<8x128xf32>, vector<8x128xf32> -> vector<8x256xf32>
    %c0_13 = arith.constant 0 : index
    %c0_14 = arith.constant 0 : index
    %18 = vector.load %arg5[%c0_13, %c0_14] : memref<1x128xf32, #tpu.memory_space<vmem>>, vector<1x128xf32>
    %c0_15 = arith.constant 0 : index
    %c0_16 = arith.constant 0 : index
    %19 = vector.load %arg4[%c0_15, %c0_16] : memref<256x128xf32, #tpu.memory_space<vmem>>, vector<256x128xf32>
    %cst_17 = arith.constant dense<0.000000e+00> : vector<8x128xf32>
    %20 = tpu.matmul %17, %19, %cst_17 {dimension_numbers = #tpu.dot_dimension_numbers<[1], [0], [0], [1], [0, 0, 1, 1], [], []>} : vector<8x256xf32>, vector<256x128xf32>, vector<8x128xf32> -> vector<8x128xf32>
    %21 = vector.broadcast %18 : vector<1x128xf32> to vector<8x128xf32>
    %22 = arith.addf %21, %20 : vector<8x128xf32>
    %23 = math.tanh %22 : vector<8x128xf32>
    %24 = arith.index_cast %c0_i32 : i32 to index
    %c0_18 = arith.constant 0 : index
    %c0_19 = arith.constant 0 : index
    %25 = vector.load %arg6[%24, %c0_18, %c0_19] : memref<8x128x128xf32, #tpu.memory_space<vmem>>, vector<1x128x128xf32>
    %26 = vector.shape_cast %25 : vector<1x128x128xf32> to vector<128x128xf32>
    %cst_20 = arith.constant dense<0.000000e+00> : vector<8x128xf32>
    %27 = tpu.matmul %23, %26, %cst_20 {dimension_numbers = #tpu.dot_dimension_numbers<[1], [0], [0], [1], [0, 0, 1, 1], [], []>} : vector<8x128xf32>, vector<128x128xf32>, vector<8x128xf32> -> vector<8x128xf32>
    %28 = arith.addf %8, %27 : vector<8x128xf32>
    %c1_i32 = arith.constant 1 : i32
    %c8_i32_21 = arith.constant 8 : i32
    %29 = arith.muli %c1_i32, %c8_i32_21 : i32
    %30 = tpu.assume_multiple %29, 8 : i32
    %31 = arith.index_cast %30 : i32 to index
    %c0_22 = arith.constant 0 : index
    %32 = vector.load %arg9[%31, %c0_22] : memref<64x128xf32, #tpu.memory_space<vmem>>, vector<8x128xf32>
    %c0_23 = arith.constant 0 : index
    %c0_24 = arith.constant 0 : index
    %33 = vector.load %arg2[%c0_23, %c0_24] : memref<128x128xf32, #tpu.memory_space<vmem>>, vector<128x128xf32>
    %cst_25 = arith.constant dense<0.000000e+00> : vector<8x128xf32>
    %34 = tpu.matmul %16, %33, %cst_25 {dimension_numbers = #tpu.dot_dimension_numbers<[1], [0], [0], [1], [0, 0, 1, 1], [], []>} : vector<8x128xf32>, vector<128x128xf32>, vector<8x128xf32> -> vector<8x128xf32>
    %35 = arith.addf %32, %34 : vector<8x128xf32>
    %36 = math.tanh %35 : vector<8x128xf32>
    %37 = tpu.concatenate %36, %23 in 1 : vector<8x128xf32>, vector<8x128xf32> -> vector<8x256xf32>
    %c0_26 = arith.constant 0 : index
    %c0_27 = arith.constant 0 : index
    %38 = vector.load %arg5[%c0_26, %c0_27] : memref<1x128xf32, #tpu.memory_space<vmem>>, vector<1x128xf32>
    %c0_28 = arith.constant 0 : index
    %c0_29 = arith.constant 0 : index
    %39 = vector.load %arg4[%c0_28, %c0_29] : memref<256x128xf32, #tpu.memory_space<vmem>>, vector<256x128xf32>
    %cst_30 = arith.constant dense<0.000000e+00> : vector<8x128xf32>
    %40 = tpu.matmul %37, %39, %cst_30 {dimension_numbers = #tpu.dot_dimension_numbers<[1], [0], [0], [1], [0, 0, 1, 1], [], []>} : vector<8x256xf32>, vector<256x128xf32>, vector<8x128xf32> -> vector<8x128xf32>
    %41 = vector.broadcast %38 : vector<1x128xf32> to vector<8x128xf32>
    %42 = arith.addf %41, %40 : vector<8x128xf32>
    %43 = math.tanh %42 : vector<8x128xf32>
    %44 = arith.index_cast %c1_i32 : i32 to index
    %c0_31 = arith.constant 0 : index
    %c0_32 = arith.constant 0 : index
    %45 = vector.load %arg6[%44, %c0_31, %c0_32] : memref<8x128x128xf32, #tpu.memory_space<vmem>>, vector<1x128x128xf32>
    %46 = vector.shape_cast %45 : vector<1x128x128xf32> to vector<128x128xf32>
    %cst_33 = arith.constant dense<0.000000e+00> : vector<8x128xf32>
    %47 = tpu.matmul %43, %46, %cst_33 {dimension_numbers = #tpu.dot_dimension_numbers<[1], [0], [0], [1], [0, 0, 1, 1], [], []>} : vector<8x128xf32>, vector<128x128xf32>, vector<8x128xf32> -> vector<8x128xf32>
    %48 = arith.addf %28, %47 : vector<8x128xf32>
    %c2_i32 = arith.constant 2 : i32
    %c8_i32_34 = arith.constant 8 : i32
    %49 = arith.muli %c2_i32, %c8_i32_34 : i32
    %50 = tpu.assume_multiple %49, 8 : i32
    %51 = arith.index_cast %50 : i32 to index
    %c0_35 = arith.constant 0 : index
    %52 = vector.load %arg9[%51, %c0_35] : memref<64x128xf32, #tpu.memory_space<vmem>>, vector<8x128xf32>
    %c0_36 = arith.constant 0 : index
    %c0_37 = arith.constant 0 : index
    %53 = vector.load %arg2[%c0_36, %c0_37] : memref<128x128xf32, #tpu.memory_space<vmem>>, vector<128x128xf32>
    %cst_38 = arith.constant dense<0.000000e+00> : vector<8x128xf32>
    %54 = tpu.matmul %36, %53, %cst_38 {dimension_numbers = #tpu.dot_dimension_numbers<[1], [0], [0], [1], [0, 0, 1, 1], [], []>} : vector<8x128xf32>, vector<128x128xf32>, vector<8x128xf32> -> vector<8x128xf32>
    %55 = arith.addf %52, %54 : vector<8x128xf32>
    %56 = math.tanh %55 : vector<8x128xf32>
    %57 = tpu.concatenate %56, %43 in 1 : vector<8x128xf32>, vector<8x128xf32> -> vector<8x256xf32>
    %c0_39 = arith.constant 0 : index
    %c0_40 = arith.constant 0 : index
    %58 = vector.load %arg5[%c0_39, %c0_40] : memref<1x128xf32, #tpu.memory_space<vmem>>, vector<1x128xf32>
    %c0_41 = arith.constant 0 : index
    %c0_42 = arith.constant 0 : index
    %59 = vector.load %arg4[%c0_41, %c0_42] : memref<256x128xf32, #tpu.memory_space<vmem>>, vector<256x128xf32>
    %cst_43 = arith.constant dense<0.000000e+00> : vector<8x128xf32>
    %60 = tpu.matmul %57, %59, %cst_43 {dimension_numbers = #tpu.dot_dimension_numbers<[1], [0], [0], [1], [0, 0, 1, 1], [], []>} : vector<8x256xf32>, vector<256x128xf32>, vector<8x128xf32> -> vector<8x128xf32>
    %61 = vector.broadcast %58 : vector<1x128xf32> to vector<8x128xf32>
    %62 = arith.addf %61, %60 : vector<8x128xf32>
    %63 = math.tanh %62 : vector<8x128xf32>
    %64 = arith.index_cast %c2_i32 : i32 to index
    %c0_44 = arith.constant 0 : index
    %c0_45 = arith.constant 0 : index
    %65 = vector.load %arg6[%64, %c0_44, %c0_45] : memref<8x128x128xf32, #tpu.memory_space<vmem>>, vector<1x128x128xf32>
    %66 = vector.shape_cast %65 : vector<1x128x128xf32> to vector<128x128xf32>
    %cst_46 = arith.constant dense<0.000000e+00> : vector<8x128xf32>
    %67 = tpu.matmul %63, %66, %cst_46 {dimension_numbers = #tpu.dot_dimension_numbers<[1], [0], [0], [1], [0, 0, 1, 1], [], []>} : vector<8x128xf32>, vector<128x128xf32>, vector<8x128xf32> -> vector<8x128xf32>
    %68 = arith.addf %48, %67 : vector<8x128xf32>
    %c3_i32 = arith.constant 3 : i32
    %c8_i32_47 = arith.constant 8 : i32
    %69 = arith.muli %c3_i32, %c8_i32_47 : i32
    %70 = tpu.assume_multiple %69, 8 : i32
    %71 = arith.index_cast %70 : i32 to index
    %c0_48 = arith.constant 0 : index
    %72 = vector.load %arg9[%71, %c0_48] : memref<64x128xf32, #tpu.memory_space<vmem>>, vector<8x128xf32>
    %c0_49 = arith.constant 0 : index
    %c0_50 = arith.constant 0 : index
    %73 = vector.load %arg2[%c0_49, %c0_50] : memref<128x128xf32, #tpu.memory_space<vmem>>, vector<128x128xf32>
    %cst_51 = arith.constant dense<0.000000e+00> : vector<8x128xf32>
    %74 = tpu.matmul %56, %73, %cst_51 {dimension_numbers = #tpu.dot_dimension_numbers<[1], [0], [0], [1], [0, 0, 1, 1], [], []>} : vector<8x128xf32>, vector<128x128xf32>, vector<8x128xf32> -> vector<8x128xf32>
    %75 = arith.addf %72, %74 : vector<8x128xf32>
    %76 = math.tanh %75 : vector<8x128xf32>
    %77 = tpu.concatenate %76, %63 in 1 : vector<8x128xf32>, vector<8x128xf32> -> vector<8x256xf32>
    %c0_52 = arith.constant 0 : index
    %c0_53 = arith.constant 0 : index
    %78 = vector.load %arg5[%c0_52, %c0_53] : memref<1x128xf32, #tpu.memory_space<vmem>>, vector<1x128xf32>
    %c0_54 = arith.constant 0 : index
    %c0_55 = arith.constant 0 : index
    %79 = vector.load %arg4[%c0_54, %c0_55] : memref<256x128xf32, #tpu.memory_space<vmem>>, vector<256x128xf32>
    %cst_56 = arith.constant dense<0.000000e+00> : vector<8x128xf32>
    %80 = tpu.matmul %77, %79, %cst_56 {dimension_numbers = #tpu.dot_dimension_numbers<[1], [0], [0], [1], [0, 0, 1, 1], [], []>} : vector<8x256xf32>, vector<256x128xf32>, vector<8x128xf32> -> vector<8x128xf32>
    %81 = vector.broadcast %78 : vector<1x128xf32> to vector<8x128xf32>
    %82 = arith.addf %81, %80 : vector<8x128xf32>
    %83 = math.tanh %82 : vector<8x128xf32>
    %84 = arith.index_cast %c3_i32 : i32 to index
    %c0_57 = arith.constant 0 : index
    %c0_58 = arith.constant 0 : index
    %85 = vector.load %arg6[%84, %c0_57, %c0_58] : memref<8x128x128xf32, #tpu.memory_space<vmem>>, vector<1x128x128xf32>
    %86 = vector.shape_cast %85 : vector<1x128x128xf32> to vector<128x128xf32>
    %cst_59 = arith.constant dense<0.000000e+00> : vector<8x128xf32>
    %87 = tpu.matmul %83, %86, %cst_59 {dimension_numbers = #tpu.dot_dimension_numbers<[1], [0], [0], [1], [0, 0, 1, 1], [], []>} : vector<8x128xf32>, vector<128x128xf32>, vector<8x128xf32> -> vector<8x128xf32>
    %88 = arith.addf %68, %87 : vector<8x128xf32>
    %c4_i32 = arith.constant 4 : i32
    %c8_i32_60 = arith.constant 8 : i32
    %89 = arith.muli %c4_i32, %c8_i32_60 : i32
    %90 = tpu.assume_multiple %89, 8 : i32
    %91 = arith.index_cast %90 : i32 to index
    %c0_61 = arith.constant 0 : index
    %92 = vector.load %arg9[%91, %c0_61] : memref<64x128xf32, #tpu.memory_space<vmem>>, vector<8x128xf32>
    %c0_62 = arith.constant 0 : index
    %c0_63 = arith.constant 0 : index
    %93 = vector.load %arg2[%c0_62, %c0_63] : memref<128x128xf32, #tpu.memory_space<vmem>>, vector<128x128xf32>
    %cst_64 = arith.constant dense<0.000000e+00> : vector<8x128xf32>
    %94 = tpu.matmul %76, %93, %cst_64 {dimension_numbers = #tpu.dot_dimension_numbers<[1], [0], [0], [1], [0, 0, 1, 1], [], []>} : vector<8x128xf32>, vector<128x128xf32>, vector<8x128xf32> -> vector<8x128xf32>
    %95 = arith.addf %92, %94 : vector<8x128xf32>
    %96 = math.tanh %95 : vector<8x128xf32>
    %97 = tpu.concatenate %96, %83 in 1 : vector<8x128xf32>, vector<8x128xf32> -> vector<8x256xf32>
    %c0_65 = arith.constant 0 : index
    %c0_66 = arith.constant 0 : index
    %98 = vector.load %arg5[%c0_65, %c0_66] : memref<1x128xf32, #tpu.memory_space<vmem>>, vector<1x128xf32>
    %c0_67 = arith.constant 0 : index
    %c0_68 = arith.constant 0 : index
    %99 = vector.load %arg4[%c0_67, %c0_68] : memref<256x128xf32, #tpu.memory_space<vmem>>, vector<256x128xf32>
    %cst_69 = arith.constant dense<0.000000e+00> : vector<8x128xf32>
    %100 = tpu.matmul %97, %99, %cst_69 {dimension_numbers = #tpu.dot_dimension_numbers<[1], [0], [0], [1], [0, 0, 1, 1], [], []>} : vector<8x256xf32>, vector<256x128xf32>, vector<8x128xf32> -> vector<8x128xf32>
    %101 = vector.broadcast %98 : vector<1x128xf32> to vector<8x128xf32>
    %102 = arith.addf %101, %100 : vector<8x128xf32>
    %103 = math.tanh %102 : vector<8x128xf32>
    %104 = arith.index_cast %c4_i32 : i32 to index
    %c0_70 = arith.constant 0 : index
    %c0_71 = arith.constant 0 : index
    %105 = vector.load %arg6[%104, %c0_70, %c0_71] : memref<8x128x128xf32, #tpu.memory_space<vmem>>, vector<1x128x128xf32>
    %106 = vector.shape_cast %105 : vector<1x128x128xf32> to vector<128x128xf32>
    %cst_72 = arith.constant dense<0.000000e+00> : vector<8x128xf32>
    %107 = tpu.matmul %103, %106, %cst_72 {dimension_numbers = #tpu.dot_dimension_numbers<[1], [0], [0], [1], [0, 0, 1, 1], [], []>} : vector<8x128xf32>, vector<128x128xf32>, vector<8x128xf32> -> vector<8x128xf32>
    %108 = arith.addf %88, %107 : vector<8x128xf32>
    %c5_i32 = arith.constant 5 : i32
    %c8_i32_73 = arith.constant 8 : i32
    %109 = arith.muli %c5_i32, %c8_i32_73 : i32
    %110 = tpu.assume_multiple %109, 8 : i32
    %111 = arith.index_cast %110 : i32 to index
    %c0_74 = arith.constant 0 : index
    %112 = vector.load %arg9[%111, %c0_74] : memref<64x128xf32, #tpu.memory_space<vmem>>, vector<8x128xf32>
    %c0_75 = arith.constant 0 : index
    %c0_76 = arith.constant 0 : index
    %113 = vector.load %arg2[%c0_75, %c0_76] : memref<128x128xf32, #tpu.memory_space<vmem>>, vector<128x128xf32>
    %cst_77 = arith.constant dense<0.000000e+00> : vector<8x128xf32>
    %114 = tpu.matmul %96, %113, %cst_77 {dimension_numbers = #tpu.dot_dimension_numbers<[1], [0], [0], [1], [0, 0, 1, 1], [], []>} : vector<8x128xf32>, vector<128x128xf32>, vector<8x128xf32> -> vector<8x128xf32>
    %115 = arith.addf %112, %114 : vector<8x128xf32>
    %116 = math.tanh %115 : vector<8x128xf32>
    %117 = tpu.concatenate %116, %103 in 1 : vector<8x128xf32>, vector<8x128xf32> -> vector<8x256xf32>
    %c0_78 = arith.constant 0 : index
    %c0_79 = arith.constant 0 : index
    %118 = vector.load %arg5[%c0_78, %c0_79] : memref<1x128xf32, #tpu.memory_space<vmem>>, vector<1x128xf32>
    %c0_80 = arith.constant 0 : index
    %c0_81 = arith.constant 0 : index
    %119 = vector.load %arg4[%c0_80, %c0_81] : memref<256x128xf32, #tpu.memory_space<vmem>>, vector<256x128xf32>
    %cst_82 = arith.constant dense<0.000000e+00> : vector<8x128xf32>
    %120 = tpu.matmul %117, %119, %cst_82 {dimension_numbers = #tpu.dot_dimension_numbers<[1], [0], [0], [1], [0, 0, 1, 1], [], []>} : vector<8x256xf32>, vector<256x128xf32>, vector<8x128xf32> -> vector<8x128xf32>
    %121 = vector.broadcast %118 : vector<1x128xf32> to vector<8x128xf32>
    %122 = arith.addf %121, %120 : vector<8x128xf32>
    %123 = math.tanh %122 : vector<8x128xf32>
    %124 = arith.index_cast %c5_i32 : i32 to index
    %c0_83 = arith.constant 0 : index
    %c0_84 = arith.constant 0 : index
    %125 = vector.load %arg6[%124, %c0_83, %c0_84] : memref<8x128x128xf32, #tpu.memory_space<vmem>>, vector<1x128x128xf32>
    %126 = vector.shape_cast %125 : vector<1x128x128xf32> to vector<128x128xf32>
    %cst_85 = arith.constant dense<0.000000e+00> : vector<8x128xf32>
    %127 = tpu.matmul %123, %126, %cst_85 {dimension_numbers = #tpu.dot_dimension_numbers<[1], [0], [0], [1], [0, 0, 1, 1], [], []>} : vector<8x128xf32>, vector<128x128xf32>, vector<8x128xf32> -> vector<8x128xf32>
    %128 = arith.addf %108, %127 : vector<8x128xf32>
    %c6_i32 = arith.constant 6 : i32
    %c8_i32_86 = arith.constant 8 : i32
    %129 = arith.muli %c6_i32, %c8_i32_86 : i32
    %130 = tpu.assume_multiple %129, 8 : i32
    %131 = arith.index_cast %130 : i32 to index
    %c0_87 = arith.constant 0 : index
    %132 = vector.load %arg9[%131, %c0_87] : memref<64x128xf32, #tpu.memory_space<vmem>>, vector<8x128xf32>
    %c0_88 = arith.constant 0 : index
    %c0_89 = arith.constant 0 : index
    %133 = vector.load %arg2[%c0_88, %c0_89] : memref<128x128xf32, #tpu.memory_space<vmem>>, vector<128x128xf32>
    %cst_90 = arith.constant dense<0.000000e+00> : vector<8x128xf32>
    %134 = tpu.matmul %116, %133, %cst_90 {dimension_numbers = #tpu.dot_dimension_numbers<[1], [0], [0], [1], [0, 0, 1, 1], [], []>} : vector<8x128xf32>, vector<128x128xf32>, vector<8x128xf32> -> vector<8x128xf32>
    %135 = arith.addf %132, %134 : vector<8x128xf32>
    %136 = math.tanh %135 : vector<8x128xf32>
    %137 = tpu.concatenate %136, %123 in 1 : vector<8x128xf32>, vector<8x128xf32> -> vector<8x256xf32>
    %c0_91 = arith.constant 0 : index
    %c0_92 = arith.constant 0 : index
    %138 = vector.load %arg5[%c0_91, %c0_92] : memref<1x128xf32, #tpu.memory_space<vmem>>, vector<1x128xf32>
    %c0_93 = arith.constant 0 : index
    %c0_94 = arith.constant 0 : index
    %139 = vector.load %arg4[%c0_93, %c0_94] : memref<256x128xf32, #tpu.memory_space<vmem>>, vector<256x128xf32>
    %cst_95 = arith.constant dense<0.000000e+00> : vector<8x128xf32>
    %140 = tpu.matmul %137, %139, %cst_95 {dimension_numbers = #tpu.dot_dimension_numbers<[1], [0], [0], [1], [0, 0, 1, 1], [], []>} : vector<8x256xf32>, vector<256x128xf32>, vector<8x128xf32> -> vector<8x128xf32>
    %141 = vector.broadcast %138 : vector<1x128xf32> to vector<8x128xf32>
    %142 = arith.addf %141, %140 : vector<8x128xf32>
    %143 = math.tanh %142 : vector<8x128xf32>
    %144 = arith.index_cast %c6_i32 : i32 to index
    %c0_96 = arith.constant 0 : index
    %c0_97 = arith.constant 0 : index
    %145 = vector.load %arg6[%144, %c0_96, %c0_97] : memref<8x128x128xf32, #tpu.memory_space<vmem>>, vector<1x128x128xf32>
    %146 = vector.shape_cast %145 : vector<1x128x128xf32> to vector<128x128xf32>
    %cst_98 = arith.constant dense<0.000000e+00> : vector<8x128xf32>
    %147 = tpu.matmul %143, %146, %cst_98 {dimension_numbers = #tpu.dot_dimension_numbers<[1], [0], [0], [1], [0, 0, 1, 1], [], []>} : vector<8x128xf32>, vector<128x128xf32>, vector<8x128xf32> -> vector<8x128xf32>
    %148 = arith.addf %128, %147 : vector<8x128xf32>
    %c7_i32 = arith.constant 7 : i32
    %c8_i32_99 = arith.constant 8 : i32
    %149 = arith.muli %c7_i32, %c8_i32_99 : i32
    %150 = tpu.assume_multiple %149, 8 : i32
    %151 = arith.index_cast %150 : i32 to index
    %c0_100 = arith.constant 0 : index
    %152 = vector.load %arg9[%151, %c0_100] : memref<64x128xf32, #tpu.memory_space<vmem>>, vector<8x128xf32>
    %c0_101 = arith.constant 0 : index
    %c0_102 = arith.constant 0 : index
    %153 = vector.load %arg2[%c0_101, %c0_102] : memref<128x128xf32, #tpu.memory_space<vmem>>, vector<128x128xf32>
    %cst_103 = arith.constant dense<0.000000e+00> : vector<8x128xf32>
    %154 = tpu.matmul %136, %153, %cst_103 {dimension_numbers = #tpu.dot_dimension_numbers<[1], [0], [0], [1], [0, 0, 1, 1], [], []>} : vector<8x128xf32>, vector<128x128xf32>, vector<8x128xf32> -> vector<8x128xf32>
    %155 = arith.addf %152, %154 : vector<8x128xf32>
    %156 = math.tanh %155 : vector<8x128xf32>
    %157 = tpu.concatenate %156, %143 in 1 : vector<8x128xf32>, vector<8x128xf32> -> vector<8x256xf32>
    %c0_104 = arith.constant 0 : index
    %c0_105 = arith.constant 0 : index
    %158 = vector.load %arg5[%c0_104, %c0_105] : memref<1x128xf32, #tpu.memory_space<vmem>>, vector<1x128xf32>
    %c0_106 = arith.constant 0 : index
    %c0_107 = arith.constant 0 : index
    %159 = vector.load %arg4[%c0_106, %c0_107] : memref<256x128xf32, #tpu.memory_space<vmem>>, vector<256x128xf32>
    %cst_108 = arith.constant dense<0.000000e+00> : vector<8x128xf32>
    %160 = tpu.matmul %157, %159, %cst_108 {dimension_numbers = #tpu.dot_dimension_numbers<[1], [0], [0], [1], [0, 0, 1, 1], [], []>} : vector<8x256xf32>, vector<256x128xf32>, vector<8x128xf32> -> vector<8x128xf32>
    %161 = vector.broadcast %158 : vector<1x128xf32> to vector<8x128xf32>
    %162 = arith.addf %161, %160 : vector<8x128xf32>
    %163 = math.tanh %162 : vector<8x128xf32>
    %164 = arith.index_cast %c7_i32 : i32 to index
    %c0_109 = arith.constant 0 : index
    %c0_110 = arith.constant 0 : index
    %165 = vector.load %arg6[%164, %c0_109, %c0_110] : memref<8x128x128xf32, #tpu.memory_space<vmem>>, vector<1x128x128xf32>
    %166 = vector.shape_cast %165 : vector<1x128x128xf32> to vector<128x128xf32>
    %cst_111 = arith.constant dense<0.000000e+00> : vector<8x128xf32>
    %167 = tpu.matmul %163, %166, %cst_111 {dimension_numbers = #tpu.dot_dimension_numbers<[1], [0], [0], [1], [0, 0, 1, 1], [], []>} : vector<8x128xf32>, vector<128x128xf32>, vector<8x128xf32> -> vector<8x128xf32>
    %168 = arith.addf %148, %167 : vector<8x128xf32>
    %c8_i32_112 = arith.constant 8 : i32
    %c0_113 = arith.constant 0 : index
    %c0_114 = arith.constant 0 : index
    %169 = vector.load %arg7[%c0_113, %c0_114] : memref<1x128xf32, #tpu.memory_space<vmem>>, vector<1x128xf32>
    %170 = vector.broadcast %169 : vector<1x128xf32> to vector<8x128xf32>
    %171 = arith.addf %168, %170 : vector<8x128xf32>
    %c0_115 = arith.constant 0 : index
    %c0_116 = arith.constant 0 : index
    %172 = vector.load %arg8[%c0_115, %c0_116] : memref<8x128xf32, #tpu.memory_space<vmem>>, vector<8x128xf32>
    tpu.vector_store %arg8[%c0_115, %c0_116], %171 {strides = array<i32>} : memref<8x128xf32, #tpu.memory_space<vmem>>, vector<8x128xf32>,
    return
  }
}

</mosaic_0001>

<bundles_post_ra>
// kernel: tpu_custom_call.1
= control target key start
LH: loop header
LB: loop body
LE: loop exit
PB: predicated region body
PF: predicated region fallthrough
CT: control target
= control target key end

     0   :  { %13 = vsyncpa [#allocation4], 0  ;;  %s4866_s0 = inlined_call_operand.hbm [shape: f32[64,128], index: 0, kind: input, shape index: {}]   ;;  %s4867_s1 = inlined_call_operand.hbm [shape: f32[128,128], index: 1, kind: input, shape index: {}]   ;;  %s4868_s2 = inlined_call_operand.hbm [shape: f32[128,128], index: 2, kind: input, shape index: {}]   ;;  %s4869_s3 = inlined_call_operand.vmem [shape: f32[1,128], index: 3, kind: input, shape index: {}]   ;;  %s4870_s4 = inlined_call_operand.hbm [shape: f32[256,128], index: 4, kind: input, shape index: {}]   ;;  %s4871_s5 = inlined_call_operand.vmem [shape: f32[1,128], index: 5, kind: input, shape index: {}]   ;;  %s4872_s6 = inlined_call_operand.hbm [shape: f32[8,128,128], index: 6, kind: input, shape index: {}]   ;;  %s4873_s7 = inlined_call_operand.vmem [shape: f32[1,128], index: 7, kind: input, shape index: {}]   ;;  %s4874_s8 = inlined_call_operand.hbm [shape: f32[8,128], index: 8, kind: output, shape index: {}]  }
   0x1   :  { %14 = vsyncpa [#allocation7], 0 }
   0x2   :  { %15 = vsyncpa [#allocation10], 0 }
   0x3   :  { %16 = vsyncpa [#allocation5], 0  ;;  %s4231_s27 = smov [#allocation6]   ;;  %s4232_s29 = smov [#allocation9]  }
   0x4   :  { %s34_s28 = sshll.u32 %s4231_s27, 4  ;;  %s60_s30 = sshll.u32 %s4232_s29, 4  ;;  %s35_s28 = int_to_ptr.vmem [resolvable:$true] %s34_s28  ;;  %s4287_s30 = int_to_ptr.vmem [resolvable:$true] %s60_s30 }
   0x5   :  { %s4091_s11 = scalar_lea.hbm %s4867_s1, 2048 }
   0x6   :  { %p4092_p0 = scmp.ne.s32.totalorder %s4867_s1, %s4091_s11  ;;  %p4095_p1 = scmp.lt.u32.totalorder %s4091_s11, %s4867_s1 }
   0x8   :  { %p4097_p2 = pnand %p4095_p1, %p4092_p0 }
   0xa   :  { %4100 = shalt.err (!%p4097_p2)
}
   0xb   :  { %s4101_s16 = scalar_lea.vmem %s35_s28, 2048  ;;  %p4106_p4 = scmp.lt.s32.totalorder %s35_s28, %s35_s28 }
   0xc   :  { %p4102_p3 = scmp.ne.s32.totalorder %s35_s28, %s4101_s16  ;;  %p4107_p5 = scmp.lt.s32.totalorder %s4101_s16, %s4101_s16 }
   0xe   :  { %p4108_p6 = por %p4107_p5, %p4106_p4 }
  0x10   :  { %p4109_p7 = pnand %p4108_p6, %p4102_p3 }
  0x12   :  { %4112 = shalt.err (!%p4109_p7)
}
  0x13   :  { %s4233_s17 = smov 128   ;;  %s4234_s18 = smov 8  }
  0x14   :  { %40 = dma.hbm_to_vmem [thread:$0]  %s4867_s1, 2048, %s35_s28, [#allocation7], %s4233_s17, %s4233_s17, %s4234_s18  }
  0x15   :  { %s4113_s23 = scalar_lea.hbm %s4870_s4, 4096 }
  0x16   :  { %p4114_p8 = scmp.ne.s32.totalorder %s4870_s4, %s4113_s23  ;;  %p4117_p9 = scmp.lt.u32.totalorder %s4113_s23, %s4870_s4 }
  0x18   :  { %p4119_p10 = pnand %p4117_p9, %p4114_p8 }
  0x1a   :  { %4122 = shalt.err (!%p4119_p10)
}
  0x1b   :  { %s4123_s29 = scalar_lea.vmem %s4287_s30, 4096  ;;  %p4128_p12 = scmp.lt.s32.totalorder %s4287_s30, %s4287_s30 }
  0x1c   :  { %p4124_p11 = scmp.ne.s32.totalorder %s4287_s30, %s4123_s29  ;;  %p4129_p13 = scmp.lt.s32.totalorder %s4123_s29, %s4123_s29 }
  0x1e   :  { %p4130_p0 = por %p4129_p13, %p4128_p12 }
  0x20   :  { %p4131_p1 = pnand %p4130_p0, %p4124_p11 }
  0x22   :  { %4134 = shalt.err (!%p4131_p1)
}
  0x23   :  { %66 = dma.hbm_to_vmem [thread:$0]  %s4870_s4, 4096, %s4287_s30, [#allocation10], %s4233_s17, %s4233_s17, %s4234_s18  }
  0x24   :  { %s4235_s9 = smov [#allocation3]   ;;  %s4236_s11 = smov [#allocation8]  }
  0x25   :  { %s22_s10 = sshll.u32 %s4235_s9, 4  ;;  %s46_s12 = sshll.u32 %s4236_s11, 4  ;;  %s23_s10 = int_to_ptr.vmem [resolvable:$true] %s22_s10  ;;  %s4324_s12 = int_to_ptr.vmem [resolvable:$true] %s46_s12 }
  0x26   :  { %s4135_s15 = scalar_lea.hbm %s4866_s0, 1024 }
  0x27   :  { %p4136_p2 = scmp.ne.s32.totalorder %s4866_s0, %s4135_s15  ;;  %p4139_p3 = scmp.lt.u32.totalorder %s4135_s15, %s4866_s0 }
  0x29   :  { %p4141_p4 = pnand %p4139_p3, %p4136_p2 }
  0x2b   :  { %4144 = shalt.err (!%p4141_p4)
}
  0x2c   :  { %s4145_s4 = scalar_lea.vmem %s23_s10, 1024  ;;  %p4150_p6 = scmp.lt.s32.totalorder %s23_s10, %s23_s10 }
  0x2d   :  { %p4146_p5 = scmp.ne.s32.totalorder %s23_s10, %s4145_s4  ;;  %p4151_p7 = scmp.lt.s32.totalorder %s4145_s4, %s4145_s4 }
  0x2f   :  { %p4152_p8 = por %p4151_p7, %p4150_p6 }
  0x31   :  { %p4153_p9 = pnand %p4152_p8, %p4146_p5 }
  0x33   :  { %4156 = shalt.err (!%p4153_p9)
}
  0x34   :  { %28 = dma.hbm_to_vmem [thread:$0]  %s4866_s0, 1024, %s23_s10, [#allocation4], %s4233_s17, %s4233_s17, %s4234_s18  }
  0x35   :  { %s4157_s25 = scalar_lea.hbm %s4868_s2, 2048 }
  0x36   :  { %p4158_p10 = scmp.ne.s32.totalorder %s4868_s2, %s4157_s25  ;;  %p4161_p11 = scmp.lt.u32.totalorder %s4157_s25, %s4868_s2 }
  0x38   :  { %p4163_p12 = pnand %p4161_p11, %p4158_p10 }
  0x3a   :  { %4166 = shalt.err (!%p4163_p12)
}
  0x3b   :  { %s4167_s28 = scalar_lea.vmem %s4324_s12, 2048  ;;  %p4172_p0 = scmp.lt.s32.totalorder %s4324_s12, %s4324_s12 }
  0x3c   :  { %p4168_p13 = scmp.ne.s32.totalorder %s4324_s12, %s4167_s28  ;;  %p4173_p1 = scmp.lt.s32.totalorder %s4167_s28, %s4167_s28 }
  0x3e   :  { %p4174_p2 = por %p4173_p1, %p4172_p0 }
  0x40   :  { %p4175_p3 = pnand %p4174_p2, %p4168_p13 }
  0x42   :  { %4178 = shalt.err (!%p4175_p3)
}
  0x43   :  { %52 = dma.hbm_to_vmem [thread:$0]  %s4868_s2, 2048, %s4324_s12, [#allocation7], %s4233_s17, %s4233_s17, %s4234_s18  }
  0x44   :  { %s4237_s10 = smov [#allocation11]   ;;  %s4179_s15 = scalar_lea.hbm %s4872_s6, 16384 }
  0x45   :  { %s74_s11 = sshll.u32 %s4237_s10, 4  ;;  %p4180_p4 = scmp.ne.s32.totalorder %s4872_s6, %s4179_s15  ;;  %s75_s11 = int_to_ptr.vmem [resolvable:$true] %s74_s11 }
  0x46   :  { %p4183_p5 = scmp.lt.u32.totalorder %s4179_s15, %s4872_s6 }
  0x48   :  { %p4185_p6 = pnand %p4183_p5, %p4180_p4 }
  0x4a   :  { %4188 = shalt.err (!%p4185_p6)
}
  0x4b   :  { %s4189_s4 = scalar_lea.vmem %s75_s11, 16384  ;;  %p4194_p8 = scmp.lt.s32.totalorder %s75_s11, %s75_s11 }
  0x4c   :  { %p4190_p7 = scmp.ne.s32.totalorder %s75_s11, %s4189_s4  ;;  %p4195_p9 = scmp.lt.s32.totalorder %s4189_s4, %s4189_s4 }
  0x4e   :  { %p4196_p10 = por %p4195_p9, %p4194_p8 }
  0x50   :  { %p4197_p11 = pnand %p4196_p10, %p4190_p7 }
  0x52   :  { %4200 = shalt.err (!%p4197_p11)
}
  0x53   :  { %80 = dma.hbm_to_vmem [thread:$0]  %s4872_s6, 16384, %s75_s11, [#allocation10], %s4233_s17, %s4233_s17, %s4234_s18  }
  0x54   :  { %4223 = dma.done.wait [#allocation4], 1024  }
  0x55   :  { %4224 = vsyncadd [#allocation4], 4294966272 }
  0x56   :  { %4225 = dma.done.wait [#allocation7], 4096  }
  0x57   :  { %4226 = vsyncadd [#allocation7], 4294963200 }
  0x58   :  { %4227 = dma.done.wait [#allocation10], 20480  }
  0x59   :  { %4228 = vsyncadd [#allocation10], 4294946816  ;;  %v4238_v0 = vmov 0.0|0.0   ;;  %vm4239_vm0 = vmmov 0   ;;  %v4240_v1 = vmov 0.0   ;;  %v106_v2 = vld [vmem:[#allocation6] sm:$0xff] }
  0x5a   :  { %3406 = vmatprep.subr.bf16.mxu1 %v4238_v0  ;;  %2846 = vmatprep.mubr.msk.f32.mxu1 %vm4239_vm0, %v4240_v1  ;;  %v107_v3 = vld [vmem:[#allocation6 + $0x8] sm:$0xff]  ;;  %v243_v4 = vld [vmem:[#allocation8] sm:$0xff]  ;;  %v108_v7 = vld [vmem:[#allocation6 + $0x10] sm:$0xff]  ;;  %s4241_s26 = smov [#allocation12]  }
  0x5b   :  { %v3374_v5 = vpack.c.bf16 %v107_v3, %v106_v2  ;;  %v244_v6 = vld [vmem:[#allocation8 + $0x8] sm:$0xff]  ;;  %v109_v8 = vld [vmem:[#allocation6 + $0x18] sm:$0xff]  ;;  %v245_v11 = vld [vmem:[#allocation8 + $0x10] sm:$0xff]  ;;  %s2180_s27 = sshll.u32 %s4241_s26, 4  ;;  %s2181_s27 = int_to_ptr.vmem [resolvable:$true] %s2180_s27 }
  0x5c   :  { %v4379_v9 = vpack.c.bf16 %v244_v6, %v243_v4  ;;  %v3378_v10 = vpack.c.bf16 %v109_v8, %v108_v7  ;;  %v246_v12 = vld [vmem:[#allocation8 + $0x18] sm:$0xff]  ;;  %v110_v13 = vld [vmem:[#allocation6 + $0x20] sm:$0xff]  ;;  %v111_v14 = vld [vmem:[#allocation6 + $0x28] sm:$0xff]  ;;  %s4201_s29 = scalar_lea.vmem %s2181_s27, 128  ;;  %p4206_p13 = scmp.lt.s32.totalorder %s2181_s27, %s2181_s27 }
  0x5d   :  { %3375 = vmatprep.subr.bf16.mxu0 %v3374_v5  ;;  %v4382_v15 = vpack.c.bf16 %v246_v12, %v245_v11  ;;  %v3382_v16 = vpack.c.bf16 %v111_v14, %v110_v13  ;;  %v247_v17 = vld [vmem:[#allocation8 + $0x20] sm:$0xff]  ;;  %v248_v18 = vld [vmem:[#allocation8 + $0x28] sm:$0xff]  ;;  %v112_v19 = vld [vmem:[#allocation6 + $0x30] sm:$0xff]  ;;  %p4202_p12 = scmp.ne.s32.totalorder %s2181_s27, %s4201_s29  ;;  %p4207_p0 = scmp.lt.s32.totalorder %s4201_s29, %s4201_s29 }
  0x5e   :  { %3377 = vmatpush3.bf16.msra.mxu0 %v3374_v5  ;;  %3408 = vmatpush3.bf16.msra.mxu1 %v4379_v9  ;;  %v113_v20 = vld [vmem:[#allocation6 + $0x38] sm:$0xff]  ;;  %v4386_v21 = vpack.c.bf16 %v248_v18, %v247_v17  ;;  %v249_v23 = vld [vmem:[#allocation8 + $0x30] sm:$0xff]  ;;  %v114_v25 = vld [vmem:[#allocation6 + $0x40] sm:$0xff] }
  0x5f   :  { %3379 = vmatprep.subr.bf16.mxu0 %v3378_v10  ;;  %3409 = vmatprep.subr.bf16.mxu1 %v4238_v0  ;;  %v3386_v22 = vpack.c.bf16 %v113_v20, %v112_v19  ;;  %v250_v24 = vld [vmem:[#allocation8 + $0x38] sm:$0xff]  ;;  %v115_v26 = vld [vmem:[#allocation6 + $0x48] sm:$0xff]  ;;  %v98_v27 = vld [vmem:[#allocation3] sm:$0xff]  ;;  %p4208_p1 = por %p4207_p0, %p4206_p13 }
  0x60   :  { %2802 = vmatprep.mubr.f32.mxu0 %v98_v27  ;;  %v4390_v28 = vpack.c.bf16 %v250_v24, %v249_v23  ;;  %v3390_v29 = vpack.c.bf16 %v115_v26, %v114_v25  ;;  %v251_v30 = vld [vmem:[#allocation8 + $0x40] sm:$0xff]  ;;  %v252_v31 = vld [vmem:[#allocation8 + $0x48] sm:$0xff]  ;;  %v116_v32 = vld [vmem:[#allocation6 + $0x50] sm:$0xff] }
  0x61   :  { %v117_v33 = vld [vmem:[#allocation6 + $0x58] sm:$0xff]  ;;  %v4394_v34 = vpack.c.bf16 %v252_v31, %v251_v30  ;;  %v253_v36 = vld [vmem:[#allocation8 + $0x50] sm:$0xff]  ;;  %v118_v38 = vld [vmem:[#allocation6 + $0x60] sm:$0xff]  ;;  %p4209_p2 = pnand %p4208_p1, %p4202_p12 }
  0x62   :  { %3381 = vmatpush3.bf16.msra.mxu0 %v3378_v10  ;;  %3411 = vmatpush3.bf16.msra.mxu1 %v4382_v15  ;;  %v3394_v35 = vpack.c.bf16 %v117_v33, %v116_v32  ;;  %v254_v37 = vld [vmem:[#allocation8 + $0x58] sm:$0xff]  ;;  %v119_v39 = vld [vmem:[#allocation6 + $0x68] sm:$0xff]  ;;  %v255_v42 = vld [vmem:[#allocation8 + $0x60] sm:$0xff] }
  0x63   :  { %3383 = vmatprep.subr.bf16.mxu0 %v3382_v16  ;;  %3412 = vmatprep.subr.bf16.mxu1 %v4238_v0  ;;  %v4398_v40 = vpack.c.bf16 %v254_v37, %v253_v36  ;;  %v3398_v41 = vpack.c.bf16 %v119_v39, %v118_v38  ;;  %v256_v43 = vld [vmem:[#allocation8 + $0x68] sm:$0xff]  ;;  %v120_v44 = vld [vmem:[#allocation6 + $0x70] sm:$0xff]  ;;  %v121_v45 = vld [vmem:[#allocation6 + $0x78] sm:$0xff] }
  0x64   :  { %v4402_v46 = vpack.c.bf16 %v256_v43, %v255_v42  ;;  %v3402_v47 = vpack.c.bf16 %v121_v45, %v120_v44  ;;  %v257_v48 = vld [vmem:[#allocation8 + $0x70] sm:$0xff]  ;;  %v258_v49 = vld [vmem:[#allocation8 + $0x78] sm:$0xff]  ;;  %v348_v50 = vld [vmem:[#allocation9 + $0x80] sm:$0xff] }
  0x65   :  { %v349_v51 = vld [vmem:[#allocation9 + $0x88] sm:$0xff]  ;;  %v4406_v52 = vpack.c.bf16 %v258_v49, %v257_v48  ;;  %v332_v54 = vld [vmem:[#allocation9] sm:$0xff]  ;;  %v350_v56 = vld [vmem:[#allocation9 + $0x90] sm:$0xff] }
  0x66   :  { %3385 = vmatpush3.bf16.msra.mxu0 %v3382_v16  ;;  %3414 = vmatpush3.bf16.msra.mxu1 %v4386_v21  ;;  %v4409_v53 = vpack.c.bf16 %v349_v51, %v348_v50  ;;  %v333_v55 = vld [vmem:[#allocation9 + $0x8] sm:$0xff]  ;;  %v351_v57 = vld [vmem:[#allocation9 + $0x98] sm:$0xff]  ;;  %v334_v61 = vld [vmem:[#allocation9 + $0x10] sm:$0xff] }
  0x67   :  { %3387 = vmatprep.subr.bf16.mxu0 %v3386_v22  ;;  %3415 = vmatprep.subr.bf16.mxu1 %v4238_v0  ;;  %v99_v58 = vld [vmem:[#allocation3 + $0x8] sm:$0xff]  ;;  %v4412_v59 = vpack.c.bf16 %v333_v55, %v332_v54  ;;  %v4416_v60 = vpack.c.bf16 %v351_v57, %v350_v56  ;;  %v335_v62 = vld [vmem:[#allocation9 + $0x18] sm:$0xff]  ;;  %v352_v63 = vld [vmem:[#allocation9 + $0xa0] sm:$0xff] }
  0x68   :  { %v353_v2 = vld [vmem:[#allocation9 + $0xa8] sm:$0xff]  ;;  %v4421_v3 = vpack.c.bf16 %v335_v62, %v334_v61  ;;  %v336_v5 = vld [vmem:[#allocation9 + $0x20] sm:$0xff]  ;;  %v354_v7 = vld [vmem:[#allocation9 + $0xb0] sm:$0xff] }
  0x69   :  { %v4425_v4 = vpack.c.bf16 %v353_v2, %v352_v63  ;;  %v337_v6 = vld [vmem:[#allocation9 + $0x28] sm:$0xff]  ;;  %v355_v8 = vld [vmem:[#allocation9 + $0xb8] sm:$0xff]  ;;  %v338_v12 = vld [vmem:[#allocation9 + $0x30] sm:$0xff] }
  0x6a   :  { %3389 = vmatpush3.bf16.msra.mxu0 %v3386_v22  ;;  %3417 = vmatpush3.bf16.msra.mxu1 %v4390_v28  ;;  %v4431_v10 = vpack.c.bf16 %v337_v6, %v336_v5  ;;  %v4435_v11 = vpack.c.bf16 %v355_v8, %v354_v7  ;;  %v339_v13 = vld [vmem:[#allocation9 + $0x38] sm:$0xff]  ;;  %v356_v16 = vld [vmem:[#allocation9 + $0xc0] sm:$0xff]  ;;  %v357_v17 = vld [vmem:[#allocation9 + $0xc8] sm:$0xff] }
  0x6b   :  { %3391 = vmatprep.subr.bf16.mxu0 %v3390_v29  ;;  %3418 = vmatprep.subr.bf16.mxu1 %v4238_v0  ;;  %v4439_v14 = vpack.c.bf16 %v339_v13, %v338_v12  ;;  %v4454_v18 = vpack.c.bf16 %v357_v17, %v356_v16  ;;  %v340_v19 = vld [vmem:[#allocation9 + $0x40] sm:$0xff]  ;;  %v341_v20 = vld [vmem:[#allocation9 + $0x48] sm:$0xff]  ;;  %v100_v23 = vld [vmem:[#allocation3 + $0x10] sm:$0xff] }
  0x6c   :  { %v4456_v22 = vpack.c.bf16 %v341_v20, %v340_v19  ;;  %v358_v24 = vld [vmem:[#allocation9 + $0xd0] sm:$0xff]  ;;  %v359_v25 = vld [vmem:[#allocation9 + $0xd8] sm:$0xff]  ;;  %v102_v32 = vld [vmem:[#allocation3 + $0x20] sm:$0xff] }
  0x6d   :  { %v101_v26 = vld [vmem:[#allocation3 + $0x18] sm:$0xff]  ;;  %v4460_v27 = vpack.c.bf16 %v359_v25, %v358_v24  ;;  %v103_v33 = vld [vmem:[#allocation3 + $0x28] sm:$0xff]  ;;  %v344_v37 = vld [vmem:[#allocation9 + $0x60] sm:$0xff] }
  0x6e   :  { %3393 = vmatpush3.bf16.msra.mxu0 %v3390_v29  ;;  %3420 = vmatpush3.bf16.msra.mxu1 %v4394_v34  ;;  %v342_v29 = vld [vmem:[#allocation9 + $0x50] sm:$0xff]  ;;  %v343_v30 = vld [vmem:[#allocation9 + $0x58] sm:$0xff]  ;;  %v361_v36 = vld [vmem:[#allocation9 + $0xe8] sm:$0xff] }
  0x6f   :  { %3395 = vmatprep.subr.bf16.mxu0 %v3394_v35  ;;  %3421 = vmatprep.subr.bf16.mxu1 %v4238_v0  ;;  %v4462_v31 = vpack.c.bf16 %v343_v30, %v342_v29  ;;  %v345_v38 = vld [vmem:[#allocation9 + $0x68] sm:$0xff]  ;;  %v104_v42 = vld [vmem:[#allocation3 + $0x30] sm:$0xff]  ;;  %v105_v43 = vld [vmem:[#allocation3 + $0x38] sm:$0xff] }
  0x70   :  { %v362_v44 = vld [vmem:[#allocation9 + $0xf0] sm:$0xff]  ;;  %v363_v45 = vld [vmem:[#allocation9 + $0xf8] sm:$0xff]  ;;  %v4483_v51 = vld [vmem:[%s4869_s3] ss:$0 sm:$0xff] }
  0x71   :  { %v347_v48 = vld [vmem:[#allocation9 + $0x78] sm:$0xff]  ;;  %v4471_v49 = vpack.c.bf16 %v363_v45, %v362_v44  ;;  %v605_v12 = vld [vmem:[#allocation11 + $0x80] sm:$0xff]  ;;  %v606_v13 = vld [vmem:[#allocation11 + $0x88] sm:$0xff] }
  0x72   :  { %3397 = vmatpush3.bf16.msra.mxu0 %v3394_v35  ;;  %3423 = vmatpush3.bf16.msra.mxu1 %v4398_v40  ;;  %v360_v35 = vld [vmem:[#allocation9 + $0xe0] sm:$0xff]  ;;  %v607_v16 = vld [vmem:[#allocation11 + $0x90] sm:$0xff]  ;;  %v3519_v17 = vpack.c.bf16 %v606_v13, %v605_v12  ;;  %v608_v19 = vld [vmem:[#allocation11 + $0x98] sm:$0xff] }
  0x73   :  { %3399 = vmatprep.subr.bf16.mxu0 %v3398_v41  ;;  %3424 = vmatprep.subr.bf16.mxu1 %v4238_v0  ;;  %v4466_v39 = vpack.c.bf16 %v361_v36, %v360_v35  ;;  %v3522_v20 = vpack.c.bf16 %v608_v19, %v607_v16  ;;  %v610_v24 = vld [vmem:[#allocation11 + $0xa8] sm:$0xff]  ;;  %v612_v29 = vld [vmem:[#allocation11 + $0xb8] sm:$0xff]  ;;  %v442_v45 = vld [vmem:[#allocation11] sm:$0xff] }
  0x74   :  { %v448_v13 = vld [vmem:[#allocation11 + $0x30] sm:$0xff]  ;;  %v449_v16 = vld [vmem:[#allocation11 + $0x38] sm:$0xff]  ;;  %v450_v19 = vld [vmem:[#allocation11 + $0x40] sm:$0xff] }
  0x76   :  { %3401 = vmatpush3.bf16.msra.mxu0 %v3398_v41  ;;  %3426 = vmatpush3.bf16.msra.mxu1 %v4402_v46  ;;  %v4468_v41 = vpack.c.bf16 %v345_v38, %v344_v37  ;;  %v4524_v37 = vld [vmem:[%s4871_s5] ss:$0 sm:$0xff] }
  0x77   :  { %3403 = vmatprep.subr.bf16.mxu0 %v3402_v47  ;;  %3427 = vmatprep.subr.bf16.mxu1 %v4238_v0 }
  0x7a   :  { %3405 = vmatpush3.bf16.msra.mxu0 %v3402_v47  ;;  %3429 = vmatpush3.bf16.msra.mxu1 %v4406_v52  ;;  %v346_v47 = vld [vmem:[#allocation9 + $0x70] sm:$0xff] }
  0x7b   :  { %3431 = vmatprep.subr.bf16.mxu0 %v4409_v53  ;;  %3462 = vmatprep.subr.bf16.mxu1 %v4238_v0  ;;  %v4474_v50 = vpack.c.bf16 %v347_v48, %v346_v47  ;;  %v443_v47 = vld [vmem:[#allocation11 + $0x8] sm:$0xff] }
  0x7c   :  { %v3543_v48 = vpack.c.bf16 %v443_v47, %v442_v45  ;;  %v616_v45 = vld [vmem:[#allocation11 + $0xd8] sm:$0xff] }
  0x7d   :  { %2803 = vmatmul.mubr.f32.vlgmr.msra.gmra.mrb[0].mxu0 %v99_v58  ;;  %2847 = vmatmul.mubr.f32.vlgmr.msra.gmra.mrb[0].mxu1 %v4240_v1 }
  0x7e   :  { %3433 = vmatpush3.bf16.msra.mxu0 %v4412_v59  ;;  %3464 = vmatpush3.bf16.msra.mxu1 %v4379_v9 }
  0x7f   :  { %3435 = vmatprep.subr.bf16.mxu0 %v4416_v60  ;;  %3465 = vmatprep.subr.bf16.mxu1 %v4238_v0 }
  0x80   :  { %2881 = vmatprep.mubr.msk.f32.mxu1 %vm4239_vm0, %v4240_v1  ;;  %2805 = vmatprep.mubr.f32.mxu0 %v100_v23  ;;  %v609_v23 = vld [vmem:[#allocation11 + $0xa0] sm:$0xff] }
  0x81   :  { %2806 = vmatmul.mubr.f32.gmra.mrb[2].mxu0 %v101_v26  ;;  %v3525_v25 = vpack.c.bf16 %v610_v24, %v609_v23  ;;  %v611_v26 = vld [vmem:[#allocation11 + $0xb0] sm:$0xff] }
  0x82   :  { %3437 = vmatpush3.bf16.msra.mxu0 %v4421_v3  ;;  %3467 = vmatpush3.bf16.msra.mxu1 %v4382_v15  ;;  %v3528_v30 = vpack.c.bf16 %v612_v29, %v611_v26  ;;  %v452_v24 = vld [vmem:[#allocation11 + $0x50] sm:$0xff]  ;;  %v454_v29 = vld [vmem:[#allocation11 + $0x60] sm:$0xff] }
  0x83   :  { %3439 = vmatprep.subr.bf16.mxu0 %v4425_v4  ;;  %3468 = vmatprep.subr.bf16.mxu1 %v4238_v0 }
  0x84   :  { %2808 = vmatprep.mubr.f32.mxu0 %v102_v32 }
  0x85   :  { %2809 = vmatmul.mubr.f32.gmra.mrb[4].mxu0 %v103_v33 }
  0x86   :  { %3441 = vmatpush3.bf16.msra.mxu0 %v4431_v10  ;;  %3470 = vmatpush3.bf16.msra.mxu1 %v4386_v21 }
  0x87   :  { %3443 = vmatprep.subr.bf16.mxu0 %v4435_v11  ;;  %3471 = vmatprep.subr.bf16.mxu1 %v4238_v0 }
  0x88   :  { %2811 = vmatprep.mubr.f32.mxu0 %v104_v42 }
  0x89   :  { %2812 = vmatmul.mubr.f32.gmra.mrb[6].mxu0 %v105_v43 }
  0x8a   :  { %3445 = vmatpush3.bf16.msra.mxu0 %v4439_v14  ;;  %3473 = vmatpush3.bf16.msra.mxu1 %v4390_v28 }
  0x8b   :  { %3474 = vmatprep.subr.bf16.mxu1 %v4238_v0  ;;  %3447 = vmatprep.subr.bf16.mxu0 %v4454_v18 }
  0x8c   :  { %428 = vmatprep.mubr.f32.mxu0 %v4240_v1 }
  0x8e   :  { %3476 = vmatpush3.bf16.msra.mxu1 %v4394_v34  ;;  %3449 = vmatpush3.bf16.msra.mxu0 %v4456_v22 }
  0x8f   :  { %3477 = vmatprep.subr.bf16.mxu1 %v4238_v0  ;;  %3451 = vmatprep.subr.bf16.mxu0 %v4460_v27 }
  0x92   :  { %3479 = vmatpush3.bf16.msra.mxu1 %v4398_v40  ;;  %3453 = vmatpush3.bf16.msra.mxu0 %v4462_v31 }
  0x93   :  { %3480 = vmatprep.subr.bf16.mxu1 %v4238_v0  ;;  %3455 = vmatprep.subr.bf16.mxu0 %v4466_v39 }
  0x96   :  { %3482 = vmatpush3.bf16.msra.mxu1 %v4402_v46  ;;  %3457 = vmatpush3.bf16.msra.mxu0 %v4468_v41 }
  0x97   :  { %3483 = vmatprep.subr.bf16.mxu1 %v4238_v0  ;;  %3459 = vmatprep.subr.bf16.mxu0 %v4471_v49 }
  0x9a   :  { %3485 = vmatpush3.bf16.msra.mxu1 %v4406_v52  ;;  %3461 = vmatpush3.bf16.msra.mxu0 %v4474_v50 }
  0x9b   :  { %3518 = vmatprep.subr.bf16.mxu1 %v4238_v0  ;;  %3487 = vmatprep.subr.bf16.mxu0 %v4409_v53 }
 0x150   :  { %v2804_v54 = vpop.f32.mrb[0].mxu0  ;;  %v325_v55 = vpop.f32.mrb[0].mxu1 }
 0x151   :  { %v195_v56 = vpop.f32.mrb[1].mxu0  ;;  %v2848_v57 = vpop.f32.mrb[1].mxu1  ;;  %v201_v32 = vadd.f32 %v2804_v54, %v4483_v51  ;;  %v444_v54 = vld [vmem:[#allocation11 + $0x10] sm:$0xff] }
 0x152   :  { %v196_v58 = vadd.f32 %v4483_v51, %v195_v56  ;;  %v445_v56 = vld [vmem:[#allocation11 + $0x18] sm:$0xff] }
 0x154   :  { %v329_v61 = vadd.f32 %v325_v55, %v196_v58  ;;  %v4504_v63 = vpop.f32.mrb[2].mxu0  ;;  %v3546_v58 = vpack.c.bf16 %v445_v56, %v444_v54  ;;  %v619_v56 = vld [vmem:[#allocation11 + $0xf0] sm:$0xff] }
 0x155   :  { %v4506_v2 = vpop.f32.mrb[3].mxu0 }
 0x156   :  { %4057 = vtanh.f32 %v329_v61  ;;  %v446_v61 = vld [vmem:[#allocation11 + $0x20] sm:$0xff] }
 0x158   :  { %v4508_v5 = vpop.f32.mrb[4].mxu0 }
 0x159   :  { %v4510_v6 = vpop.f32.mrb[5].mxu0 }
 0x15c   :  { %v4512_v7 = vpop.f32.mrb[6].mxu0 }
 0x15d   :  { %v4514_v8 = vpop.f32.mrb[7].mxu0 }
 0x160   :  { %v4058_v62 = vpop.eup %4057 }
 0x161   :  { %429 = vmatmul.mubr.f32.vlgmr.msra.gmra.mrb[8].mxu0 %v4058_v62  ;;  %2882 = vmatmul.mubr.f32.vlgmr.msra.gmra.mrb[2].mxu1 %v4058_v62  ;;  %v447_v62 = vld [vmem:[#allocation11 + $0x28] sm:$0xff] }
 0x162   :  { %3489 = vmatpush3.bf16.msra.mxu0 %v4412_v59  ;;  %2916 = vmatprep.mubr.msk.f32.mxu1 %vm4239_vm0, %v4240_v1  ;;  %v3549_v12 = vpack.c.bf16 %v447_v62, %v446_v61 }
 0x163   :  { %3491 = vmatprep.subr.bf16.mxu0 %v4416_v60  ;;  %3520 = vmatpush3.bf16.msra.mxu1 %v3519_v17  ;;  %v3552_v17 = vpack.c.bf16 %v449_v16, %v448_v13 }
 0x164   :  { %3521 = vmatprep.subr.bf16.mxu1 %v4238_v0 }
 0x166   :  { %3493 = vmatpush3.bf16.msra.mxu0 %v4421_v3 }
 0x167   :  { %3495 = vmatprep.subr.bf16.mxu0 %v4425_v4  ;;  %3523 = vmatpush3.bf16.msra.mxu1 %v3522_v20  ;;  %v451_v20 = vld [vmem:[#allocation11 + $0x48] sm:$0xff] }
 0x168   :  { %3524 = vmatprep.subr.bf16.mxu1 %v4238_v0  ;;  %v3555_v23 = vpack.c.bf16 %v451_v20, %v450_v19 }
 0x16a   :  { %3497 = vmatpush3.bf16.msra.mxu0 %v4431_v10 }
 0x16b   :  { %3499 = vmatprep.subr.bf16.mxu0 %v4435_v11  ;;  %3526 = vmatpush3.bf16.msra.mxu1 %v3525_v25  ;;  %v453_v25 = vld [vmem:[#allocation11 + $0x58] sm:$0xff] }
 0x16c   :  { %3527 = vmatprep.subr.bf16.mxu1 %v4238_v0  ;;  %v3558_v26 = vpack.c.bf16 %v453_v25, %v452_v24  ;;  %v909_v24 = vld [vmem:[#allocation11 + $0x108] sm:$0xff]  ;;  %v910_v25 = vld [vmem:[#allocation11 + $0x110] sm:$0xff] }
 0x16e   :  { %3501 = vmatpush3.bf16.msra.mxu0 %v4439_v14 }
 0x16f   :  { %3503 = vmatprep.subr.bf16.mxu0 %v4454_v18  ;;  %3529 = vmatpush3.bf16.msra.mxu1 %v3528_v30  ;;  %v455_v30 = vld [vmem:[#allocation11 + $0x68] sm:$0xff] }
 0x170   :  { %3530 = vmatprep.subr.bf16.mxu1 %v4238_v0 }
 0x172   :  { %3505 = vmatpush3.bf16.msra.mxu0 %v4456_v22 }
 0x173   :  { %3507 = vmatprep.subr.bf16.mxu0 %v4460_v27 }
 0x176   :  { %3509 = vmatpush3.bf16.msra.mxu0 %v4462_v31 }
 0x177   :  { %3511 = vmatprep.subr.bf16.mxu0 %v4466_v39 }
 0x17a   :  { %3513 = vmatpush3.bf16.msra.mxu0 %v4468_v41 }
 0x17b   :  { %3515 = vmatprep.subr.bf16.mxu0 %v4471_v49 }
 0x17e   :  { %3517 = vmatpush3.bf16.msra.mxu0 %v4474_v50 }
 0x17f   :  { %3542 = vmatprep.subr.bf16.mxu0 %v4238_v0 }
 0x234   :  { %v2267_v33 = vpop.f32.mrb[8].mxu0  ;;  %v526_v35 = vpop.f32.mrb[2].mxu1 }
 0x235   :  { %v530_v36 = vadd.f32 %v526_v35, %v201_v32  ;;  %v2268_v38 = vpop.f32.mrb[9].mxu0  ;;  %v2883_v42 = vpop.f32.mrb[3].mxu1  ;;  %v3561_v32 = vpack.c.bf16 %v455_v30, %v454_v29  ;;  %v457_v35 = vld [vmem:[#allocation11 + $0x78] sm:$0xff] }
 0x236   :  { %v2269_v43 = vadd.f32 %v2268_v38, %v2267_v33  ;;  %v456_v33 = vld [vmem:[#allocation11 + $0x70] sm:$0xff]  ;;  %v613_v38 = vld [vmem:[#allocation11 + $0xc0] sm:$0xff]  ;;  %v614_v42 = vld [vmem:[#allocation11 + $0xc8] sm:$0xff] }
 0x237   :  { %v911_v29 = vld [vmem:[#allocation11 + $0x118] sm:$0xff] }
 0x238   :  { %v440_v44 = vadd.f32 %v2269_v43, %v4524_v37  ;;  %v3531_v43 = vpack.c.bf16 %v614_v42, %v613_v38  ;;  %v3626_v30 = vpack.c.bf16 %v911_v29, %v910_v25 }
 0x23a   :  { %4059 = vtanh.f32 %v440_v44  ;;  %3532 = vmatpush3.bf16.msra.mxu1 %v3531_v43  ;;  %v615_v44 = vld [vmem:[#allocation11 + $0xd0] sm:$0xff] }
 0x23b   :  { %4061 = vtanh.f32 %v530_v36  ;;  %v3564_v36 = vpack.c.bf16 %v457_v35, %v456_v33  ;;  %3533 = vmatprep.subr.bf16.mxu1 %v4238_v0  ;;  %v3534_v47 = vpack.c.bf16 %v616_v45, %v615_v44  ;;  %v913_v33 = vld [vmem:[#allocation11 + $0x128] sm:$0xff]  ;;  %v206_v45 = vadd.f32 %v4483_v51, %v4506_v2  ;;  %v916_v2 = vld [vmem:[#allocation11 + $0x140] sm:$0xff] }
 0x23e   :  { %3535 = vmatpush3.bf16.msra.mxu1 %v3534_v47 }
 0x23f   :  { %3536 = vmatprep.subr.bf16.mxu1 %v4238_v0 }
 0x244   :  { %v4060_v55 = vpop.eup %4059 }
 0x245   :  { %v4527_v57 = vpop.eup %4061  ;;  %596 = vmatprep.mubr.f32.mxu0 %v4060_v55 }
 0x246   :  { %597 = vmatmul.mubr.f32.vlgmr.msra.gmra.mrb[10].mxu0 %v4527_v57 }
 0x247   :  { %3544 = vmatpush3.bf16.msra.mxu0 %v3543_v48  ;;  %2951 = vmatprep.mubr.msk.f32.mxu0 %vm4239_vm0, %v4240_v1  ;;  %v617_v48 = vld [vmem:[#allocation11 + $0xe0] sm:$0xff] }
 0x248   :  { %3545 = vmatprep.subr.bf16.mxu0 %v4238_v0 }
 0x24b   :  { %3547 = vmatpush3.bf16.msra.mxu0 %v3546_v58  ;;  %v620_v58 = vld [vmem:[#allocation11 + $0xf8] sm:$0xff] }
 0x24c   :  { %3548 = vmatprep.subr.bf16.mxu0 %v4238_v0  ;;  %v3540_v61 = vpack.c.bf16 %v620_v58, %v619_v56  ;;  %v917_v56 = vld [vmem:[#allocation11 + $0x148] sm:$0xff] }
 0x24d   :  { %v3635_v58 = vpack.c.bf16 %v917_v56, %v916_v2  ;;  %v1148_v2 = vld [vmem:[#allocation11 + $0x1b0] sm:$0xff]  ;;  %v1149_v56 = vld [vmem:[#allocation11 + $0x1b8] sm:$0xff] }
 0x24f   :  { %3550 = vmatpush3.bf16.msra.mxu0 %v3549_v12 }
 0x250   :  { %3551 = vmatprep.subr.bf16.mxu0 %v4238_v0 }
 0x253   :  { %3553 = vmatpush3.bf16.msra.mxu0 %v3552_v17 }
 0x254   :  { %3554 = vmatprep.subr.bf16.mxu0 %v4238_v0 }
 0x257   :  { %3556 = vmatpush3.bf16.msra.mxu0 %v3555_v23  ;;  %v908_v23 = vld [vmem:[#allocation11 + $0x100] sm:$0xff] }
 0x258   :  { %3557 = vmatprep.subr.bf16.mxu0 %v4238_v0 }
 0x25b   :  { %3559 = vmatpush3.bf16.msra.mxu0 %v3558_v26  ;;  %v3623_v26 = vpack.c.bf16 %v909_v24, %v908_v23 }
 0x25c   :  { %3560 = vmatprep.subr.bf16.mxu0 %v4238_v0 }
 0x25f   :  { %3562 = vmatpush3.bf16.msra.mxu0 %v3561_v32  ;;  %v912_v32 = vld [vmem:[#allocation11 + $0x120] sm:$0xff] }
 0x260   :  { %3563 = vmatprep.subr.bf16.mxu0 %v4238_v0  ;;  %v3629_v35 = vpack.c.bf16 %v913_v33, %v912_v32  ;;  %v211_v32 = vadd.f32 %v4504_v63, %v4483_v51 }
 0x263   :  { %3565 = vmatpush3.bf16.msra.mxu0 %v3564_v36  ;;  %v914_v36 = vld [vmem:[#allocation11 + $0x130] sm:$0xff] }
 0x264   :  { %3591 = vmatprep.subr.bf16.mxu0 %v4409_v53 }
 0x266   :  { %2952 = vmatmul.mubr.f32.vlgmr.msra.gmra.mrb[12].mxu0 %v4060_v55  ;;  %v618_v55 = vld [vmem:[#allocation11 + $0xe8] sm:$0xff] }
 0x267   :  { %3593 = vmatpush3.bf16.msra.mxu0 %v4412_v59  ;;  %v3537_v54 = vpack.c.bf16 %v618_v55, %v617_v48 }
 0x268   :  { %3595 = vmatprep.subr.bf16.mxu0 %v4416_v60 }
 0x269   :  { %3538 = vmatpush3.bf16.msra.mxu1 %v3537_v54 }
 0x26a   :  { %3539 = vmatprep.subr.bf16.mxu1 %v4238_v0 }
 0x26b   :  { %3597 = vmatpush3.bf16.msra.mxu0 %v4421_v3 }
 0x26c   :  { %3599 = vmatprep.subr.bf16.mxu0 %v4425_v4 }
 0x26d   :  { %3541 = vmatpush3.bf16.msra.mxu1 %v3540_v61  ;;  %v918_v61 = vld [vmem:[#allocation11 + $0x150] sm:$0xff] }
 0x26e   :  { %3566 = vmatprep.subr.bf16.mxu1 %v4238_v0 }
 0x26f   :  { %3601 = vmatpush3.bf16.msra.mxu0 %v4431_v10 }
 0x270   :  { %3603 = vmatprep.subr.bf16.mxu0 %v4435_v11 }
 0x273   :  { %3605 = vmatpush3.bf16.msra.mxu0 %v4439_v14 }
 0x274   :  { %3607 = vmatprep.subr.bf16.mxu0 %v4454_v18 }
 0x277   :  { %3609 = vmatpush3.bf16.msra.mxu0 %v4456_v22 }
 0x278   :  { %3611 = vmatprep.subr.bf16.mxu0 %v4460_v27 }
 0x27b   :  { %3613 = vmatpush3.bf16.msra.mxu0 %v4462_v31 }
 0x27c   :  { %3615 = vmatprep.subr.bf16.mxu0 %v4466_v39 }
 0x27f   :  { %3617 = vmatpush3.bf16.msra.mxu0 %v4468_v41 }
 0x280   :  { %3619 = vmatprep.subr.bf16.mxu0 %v4471_v49 }
 0x283   :  { %3621 = vmatpush3.bf16.msra.mxu0 %v4474_v50 }
 0x284   :  { %3646 = vmatprep.subr.bf16.mxu0 %v4238_v0 }
 0x319   :  { %v2319_v62 = vpop.f32.mrb[10].mxu0 }
 0x31a   :  { %v2320_v12 = vpop.f32.mrb[11].mxu0 }
 0x31b   :  { %v2321_v13 = vadd.f32 %v2320_v12, %v2319_v62  ;;  %v919_v62 = vld [vmem:[#allocation11 + $0x158] sm:$0xff] }
 0x31c   :  { %v3638_v12 = vpack.c.bf16 %v919_v62, %v918_v61  ;;  %v1150_v61 = vld [vmem:[#allocation11 + $0x1c0] sm:$0xff]  ;;  %v1151_v62 = vld [vmem:[#allocation11 + $0x1c8] sm:$0xff] }
 0x31d   :  { %v602_v16 = vadd.f32 %v2321_v13, %v4524_v37  ;;  %v920_v13 = vld [vmem:[#allocation11 + $0x160] sm:$0xff] }
 0x31f   :  { %4063 = vtanh.f32 %v602_v16  ;;  %v921_v16 = vld [vmem:[#allocation11 + $0x168] sm:$0xff] }
 0x329   :  { %v4064_v17 = vpop.eup %4063 }
 0x32a   :  { %2917 = vmatmul.mubr.f32.vlgmr.msra.gmra.mrb[4].mxu1 %v4064_v17  ;;  %899 = vmatprep.mubr.f32.mxu0 %v4064_v17  ;;  %v3641_v17 = vpack.c.bf16 %v921_v16, %v920_v13  ;;  %v1152_v13 = vld [vmem:[#allocation11 + $0x1d0] sm:$0xff]  ;;  %v1153_v16 = vld [vmem:[#allocation11 + $0x1d8] sm:$0xff] }
 0x32b   :  { %3568 = vmatpush3.bf16.msra.mxu1 %v4379_v9  ;;  %2986 = vmatprep.mubr.msk.f32.mxu1 %vm4239_vm0, %v4240_v1 }
 0x32c   :  { %3569 = vmatprep.subr.bf16.mxu1 %v4238_v0 }
 0x32f   :  { %3571 = vmatpush3.bf16.msra.mxu1 %v4382_v15 }
 0x330   :  { %3572 = vmatprep.subr.bf16.mxu1 %v4238_v0 }
 0x333   :  { %3574 = vmatpush3.bf16.msra.mxu1 %v4386_v21 }
 0x334   :  { %3575 = vmatprep.subr.bf16.mxu1 %v4238_v0 }
 0x337   :  { %3577 = vmatpush3.bf16.msra.mxu1 %v4390_v28 }
 0x338   :  { %3578 = vmatprep.subr.bf16.mxu1 %v4238_v0 }
 0x339   :  { %v757_v19 = vpop.f32.mrb[12].mxu0 }
 0x33a   :  { %v2953_v20 = vpop.f32.mrb[13].mxu0 }
 0x33b   :  { %3580 = vmatpush3.bf16.msra.mxu1 %v4394_v34  ;;  %v923_v20 = vld [vmem:[#allocation11 + $0x178] sm:$0xff] }
 0x33c   :  { %3581 = vmatprep.subr.bf16.mxu1 %v4238_v0 }
 0x33f   :  { %3583 = vmatpush3.bf16.msra.mxu1 %v4398_v40 }
 0x340   :  { %3584 = vmatprep.subr.bf16.mxu1 %v4238_v0 }
 0x343   :  { %3586 = vmatpush3.bf16.msra.mxu1 %v4402_v46 }
 0x344   :  { %3587 = vmatprep.subr.bf16.mxu1 %v4238_v0 }
 0x347   :  { %3589 = vmatpush3.bf16.msra.mxu1 %v4406_v52 }
 0x348   :  { %3622 = vmatprep.subr.bf16.mxu1 %v4238_v0 }
 0x34a   :  { %2987 = vmatmul.mubr.f32.vlgmr.msra.gmra.mrb[6].mxu1 %v4527_v57  ;;  %v915_v57 = vld [vmem:[#allocation11 + $0x138] sm:$0xff] }
 0x34b   :  { %3021 = vmatprep.mubr.msk.f32.mxu1 %vm4239_vm0, %v4240_v1  ;;  %3624 = vmatpush3.bf16.msra.mxu1 %v3623_v26  ;;  %v3632_v38 = vpack.c.bf16 %v915_v57, %v914_v36  ;;  %v1142_v57 = vld [vmem:[#allocation11 + $0x180] sm:$0xff] }
 0x34c   :  { %3625 = vmatprep.subr.bf16.mxu1 %v4238_v0 }
 0x34f   :  { %3627 = vmatpush3.bf16.msra.mxu1 %v3626_v30 }
 0x350   :  { %3628 = vmatprep.subr.bf16.mxu1 %v4238_v0 }
 0x353   :  { %3630 = vmatpush3.bf16.msra.mxu1 %v3629_v35 }
 0x354   :  { %3631 = vmatprep.subr.bf16.mxu1 %v4238_v0 }
 0x357   :  { %3633 = vmatpush3.bf16.msra.mxu1 %v3632_v38  ;;  %v1143_v38 = vld [vmem:[#allocation11 + $0x188] sm:$0xff] }
 0x358   :  { %3634 = vmatprep.subr.bf16.mxu1 %v4238_v0 }
 0x35b   :  { %3636 = vmatpush3.bf16.msra.mxu1 %v3635_v58  ;;  %v3712_v58 = vpack.c.bf16 %v1149_v56, %v1148_v2  ;;  %v1380_v56 = vld [vmem:[#allocation11 + $0x220] sm:$0xff] }
 0x35c   :  { %3637 = vmatprep.subr.bf16.mxu1 %v4238_v0 }
 0x35f   :  { %3639 = vmatpush3.bf16.msra.mxu1 %v3638_v12  ;;  %v3715_v12 = vpack.c.bf16 %v1151_v62, %v1150_v61  ;;  %v1382_v62 = vld [vmem:[#allocation11 + $0x230] sm:$0xff] }
 0x360   :  { %3640 = vmatprep.subr.bf16.mxu1 %v4238_v0 }
 0x363   :  { %3642 = vmatpush3.bf16.msra.mxu1 %v3641_v17  ;;  %v3718_v17 = vpack.c.bf16 %v1153_v16, %v1152_v13  ;;  %v1384_v16 = vld [vmem:[#allocation11 + $0x240] sm:$0xff] }
 0x364   :  { %3643 = vmatprep.subr.bf16.mxu1 %v4238_v0 }
 0x3fd   :  { %v687_v42 = vpop.f32.mrb[4].mxu1 }
 0x3fe   :  { %v4586_v43 = vadd.f32 %v757_v19, %v687_v42  ;;  %v2918_v44 = vpop.f32.mrb[5].mxu1  ;;  %v922_v19 = vld [vmem:[#allocation11 + $0x170] sm:$0xff] }
 0x3ff   :  { %v3644_v23 = vpack.c.bf16 %v923_v20, %v922_v19  ;;  %v1144_v42 = vld [vmem:[#allocation11 + $0x190] sm:$0xff]  ;;  %v3703_v44 = vpack.c.bf16 %v1143_v38, %v1142_v57  ;;  %v1154_v19 = vld [vmem:[#allocation11 + $0x1e0] sm:$0xff]  ;;  %v1155_v20 = vld [vmem:[#allocation11 + $0x1e8] sm:$0xff] }
 0x401   :  { %3645 = vmatpush3.bf16.msra.mxu1 %v3644_v23  ;;  %v1156_v23 = vld [vmem:[#allocation11 + $0x1f0] sm:$0xff] }
 0x402   :  { %3671 = vmatprep.subr.bf16.mxu1 %v4409_v53 }
 0x41d   :  { %v829_v47 = vpop.f32.mrb[6].mxu1 }
 0x41e   :  { %v833_v48 = vadd.f32 %v829_v47, %v206_v45  ;;  %v2988_v55 = vpop.f32.mrb[7].mxu1  ;;  %v1145_v45 = vld [vmem:[#allocation11 + $0x198] sm:$0xff] }
 0x41f   :  { %v3706_v47 = vpack.c.bf16 %v1145_v45, %v1144_v42  ;;  %v1147_v55 = vld [vmem:[#allocation11 + $0x1a8] sm:$0xff]  ;;  %v1376_v45 = vld [vmem:[#allocation11 + $0x200] sm:$0xff] }
 0x420   :  { %4065 = vtanh.f32 %v833_v48  ;;  %v1146_v48 = vld [vmem:[#allocation11 + $0x1a0] sm:$0xff] }
 0x42a   :  { %v4066_v54 = vpop.eup %4065 }
 0x42b   :  { %900 = vmatmul.mubr.f32.vlgmr.msra.gmra.mrb[14].mxu0 %v4066_v54 }
 0x42c   :  { %3648 = vmatpush3.bf16.msra.mxu0 %v4379_v9  ;;  %3056 = vmatprep.mubr.msk.f32.mxu0 %vm4239_vm0, %v4240_v1 }
 0x42d   :  { %3649 = vmatprep.subr.bf16.mxu0 %v4238_v0 }
 0x430   :  { %3651 = vmatpush3.bf16.msra.mxu0 %v4382_v15 }
 0x431   :  { %3652 = vmatprep.subr.bf16.mxu0 %v4238_v0 }
 0x434   :  { %3654 = vmatpush3.bf16.msra.mxu0 %v4386_v21 }
 0x435   :  { %3655 = vmatprep.subr.bf16.mxu0 %v4238_v0 }
 0x438   :  { %3657 = vmatpush3.bf16.msra.mxu0 %v4390_v28 }
 0x439   :  { %3658 = vmatprep.subr.bf16.mxu0 %v4238_v0 }
 0x43c   :  { %3660 = vmatpush3.bf16.msra.mxu0 %v4394_v34 }
 0x43d   :  { %3661 = vmatprep.subr.bf16.mxu0 %v4238_v0 }
 0x440   :  { %3663 = vmatpush3.bf16.msra.mxu0 %v4398_v40 }
 0x441   :  { %3664 = vmatprep.subr.bf16.mxu0 %v4238_v0 }
 0x444   :  { %3666 = vmatpush3.bf16.msra.mxu0 %v4402_v46 }
 0x445   :  { %3667 = vmatprep.subr.bf16.mxu0 %v4238_v0 }
 0x448   :  { %3669 = vmatpush3.bf16.msra.mxu0 %v4406_v52 }
 0x449   :  { %3702 = vmatprep.subr.bf16.mxu0 %v4238_v0 }
 0x44b   :  { %3057 = vmatmul.mubr.f32.vlgmr.msra.gmra.mrb[16].mxu0 %v4066_v54  ;;  %v3709_v54 = vpack.c.bf16 %v1147_v55, %v1146_v48  ;;  %v1378_v48 = vld [vmem:[#allocation11 + $0x210] sm:$0xff] }
 0x44c   :  { %3091 = vmatprep.mubr.msk.f32.mxu0 %vm4239_vm0, %v4240_v1  ;;  %3704 = vmatpush3.bf16.msra.mxu0 %v3703_v44 }
 0x44d   :  { %3705 = vmatprep.subr.bf16.mxu0 %v4238_v0 }
 0x450   :  { %3707 = vmatpush3.bf16.msra.mxu0 %v3706_v47  ;;  %v1377_v47 = vld [vmem:[#allocation11 + $0x208] sm:$0xff] }
 0x451   :  { %3708 = vmatprep.subr.bf16.mxu0 %v4238_v0  ;;  %v3783_v55 = vpack.c.bf16 %v1377_v47, %v1376_v45 }
 0x454   :  { %3710 = vmatpush3.bf16.msra.mxu0 %v3709_v54  ;;  %v1379_v54 = vld [vmem:[#allocation11 + $0x218] sm:$0xff] }
 0x455   :  { %3711 = vmatprep.subr.bf16.mxu0 %v4238_v0  ;;  %v3786_v2 = vpack.c.bf16 %v1379_v54, %v1378_v48  ;;  %v1612_v54 = vld [vmem:[#allocation11 + $0x290] sm:$0xff] }
 0x458   :  { %3713 = vmatpush3.bf16.msra.mxu0 %v3712_v58  ;;  %v1381_v58 = vld [vmem:[#allocation11 + $0x228] sm:$0xff] }
 0x459   :  { %3714 = vmatprep.subr.bf16.mxu0 %v4238_v0  ;;  %v3789_v61 = vpack.c.bf16 %v1381_v58, %v1380_v56  ;;  %v1613_v56 = vld [vmem:[#allocation11 + $0x298] sm:$0xff] }
 0x45a   :  { %v3866_v58 = vpack.c.bf16 %v1613_v56, %v1612_v54 }
 0x45c   :  { %3716 = vmatpush3.bf16.msra.mxu0 %v3715_v12  ;;  %v1383_v12 = vld [vmem:[#allocation11 + $0x238] sm:$0xff] }
 0x45d   :  { %3717 = vmatprep.subr.bf16.mxu0 %v4238_v0  ;;  %v3792_v13 = vpack.c.bf16 %v1383_v12, %v1382_v62  ;;  %v1615_v62 = vld [vmem:[#allocation11 + $0x2a8] sm:$0xff] }
 0x460   :  { %3719 = vmatpush3.bf16.msra.mxu0 %v3718_v17  ;;  %v1385_v17 = vld [vmem:[#allocation11 + $0x248] sm:$0xff] }
 0x461   :  { %3720 = vmatprep.subr.bf16.mxu0 %v4238_v0 }
 0x4fe   :  { %v2405_v24 = vpop.f32.mrb[14].mxu0 }
 0x4ff   :  { %v2406_v25 = vpop.f32.mrb[15].mxu0 }
 0x500   :  { %v2407_v26 = vadd.f32 %v2406_v25, %v2405_v24  ;;  %v3721_v24 = vpack.c.bf16 %v1155_v20, %v1154_v19  ;;  %v1157_v25 = vld [vmem:[#allocation11 + $0x1f8] sm:$0xff]  ;;  %v3795_v19 = vpack.c.bf16 %v1385_v17, %v1384_v16  ;;  %v1386_v20 = vld [vmem:[#allocation11 + $0x250] sm:$0xff] }
 0x501   :  { %v1617_v16 = vld [vmem:[#allocation11 + $0x2b8] sm:$0xff] }
 0x502   :  { %v905_v29 = vadd.f32 %v2407_v26, %v4524_v37  ;;  %3722 = vmatpush3.bf16.msra.mxu0 %v3721_v24  ;;  %v3724_v26 = vpack.c.bf16 %v1157_v25, %v1156_v23  ;;  %v1387_v23 = vld [vmem:[#allocation11 + $0x258] sm:$0xff]  ;;  %v1388_v25 = vld [vmem:[#allocation11 + $0x260] sm:$0xff] }
 0x503   :  { %3723 = vmatprep.subr.bf16.mxu0 %v4238_v0  ;;  %v3798_v24 = vpack.c.bf16 %v1387_v23, %v1386_v20  ;;  %v1619_v20 = vld [vmem:[#allocation11 + $0x2c8] sm:$0xff] }
 0x504   :  { %4067 = vtanh.f32 %v905_v29 }
 0x506   :  { %3725 = vmatpush3.bf16.msra.mxu0 %v3724_v26  ;;  %v1389_v26 = vld [vmem:[#allocation11 + $0x268] sm:$0xff] }
 0x507   :  { %3751 = vmatprep.subr.bf16.mxu0 %v4409_v53 }
 0x50e   :  { %v4068_v30 = vpop.eup %4067 }
 0x50f   :  { %3022 = vmatmul.mubr.f32.vlgmr.msra.gmra.mrb[8].mxu1 %v4068_v30 }
 0x510   :  { %3673 = vmatpush3.bf16.msra.mxu1 %v4412_v59  ;;  %1133 = vmatprep.mubr.f32.mxu1 %v4068_v30 }
 0x511   :  { %3675 = vmatprep.subr.bf16.mxu1 %v4416_v60 }
 0x514   :  { %3677 = vmatpush3.bf16.msra.mxu1 %v4421_v3 }
 0x515   :  { %3679 = vmatprep.subr.bf16.mxu1 %v4425_v4 }
 0x518   :  { %3681 = vmatpush3.bf16.msra.mxu1 %v4431_v10 }
 0x519   :  { %3683 = vmatprep.subr.bf16.mxu1 %v4435_v11 }
 0x51c   :  { %3685 = vmatpush3.bf16.msra.mxu1 %v4439_v14 }
 0x51d   :  { %3687 = vmatprep.subr.bf16.mxu1 %v4454_v18 }
 0x51e   :  { %v1063_v33 = vpop.f32.mrb[16].mxu0 }
 0x51f   :  { %v1067_v35 = vadd.f32 %v1063_v33, %v211_v32  ;;  %v3058_v36 = vpop.f32.mrb[17].mxu0 }
 0x520   :  { %3689 = vmatpush3.bf16.msra.mxu1 %v4456_v22 }
 0x521   :  { %3691 = vmatprep.subr.bf16.mxu1 %v4460_v27  ;;  %4069 = vtanh.f32 %v1067_v35 }
 0x524   :  { %3693 = vmatpush3.bf16.msra.mxu1 %v4462_v31 }
 0x525   :  { %3695 = vmatprep.subr.bf16.mxu1 %v4466_v39 }
 0x528   :  { %3697 = vmatpush3.bf16.msra.mxu1 %v4468_v41 }
 0x529   :  { %3699 = vmatprep.subr.bf16.mxu1 %v4471_v49 }
 0x52b   :  { %v4070_v63 = vpop.eup %4069 }
 0x52c   :  { %3701 = vmatpush3.bf16.msra.mxu1 %v4474_v50 }
 0x52d   :  { %3726 = vmatprep.subr.bf16.mxu1 %v4238_v0 }
 0x52f   :  { %1134 = vmatmul.mubr.f32.vlgmr.msra.gmra.mrb[10].mxu1 %v4070_v63 }
 0x530   :  { %3728 = vmatpush3.bf16.msra.mxu1 %v4379_v9  ;;  %3126 = vmatprep.mubr.msk.f32.mxu1 %vm4239_vm0, %v4240_v1 }
 0x531   :  { %3729 = vmatprep.subr.bf16.mxu1 %v4238_v0 }
 0x534   :  { %3731 = vmatpush3.bf16.msra.mxu1 %v4382_v15 }
 0x535   :  { %3732 = vmatprep.subr.bf16.mxu1 %v4238_v0 }
 0x538   :  { %3734 = vmatpush3.bf16.msra.mxu1 %v4386_v21 }
 0x539   :  { %3735 = vmatprep.subr.bf16.mxu1 %v4238_v0 }
 0x53c   :  { %3737 = vmatpush3.bf16.msra.mxu1 %v4390_v28 }
 0x53d   :  { %3738 = vmatprep.subr.bf16.mxu1 %v4238_v0 }
 0x540   :  { %3740 = vmatpush3.bf16.msra.mxu1 %v4394_v34 }
 0x541   :  { %3741 = vmatprep.subr.bf16.mxu1 %v4238_v0 }
 0x544   :  { %3743 = vmatpush3.bf16.msra.mxu1 %v4398_v40 }
 0x545   :  { %3744 = vmatprep.subr.bf16.mxu1 %v4238_v0 }
 0x548   :  { %3746 = vmatpush3.bf16.msra.mxu1 %v4402_v46 }
 0x549   :  { %3747 = vmatprep.subr.bf16.mxu1 %v4238_v0 }
 0x54c   :  { %3749 = vmatpush3.bf16.msra.mxu1 %v4406_v52 }
 0x54d   :  { %3782 = vmatprep.subr.bf16.mxu1 %v4238_v0 }
 0x54f   :  { %3127 = vmatmul.mubr.f32.vlgmr.msra.gmra.mrb[12].mxu1 %v4070_v63 }
 0x550   :  { %3161 = vmatprep.mubr.msk.f32.mxu1 %vm4239_vm0, %v4240_v1  ;;  %3784 = vmatpush3.bf16.msra.mxu1 %v3783_v55  ;;  %v1611_v55 = vld [vmem:[#allocation11 + $0x288] sm:$0xff] }
 0x551   :  { %3785 = vmatprep.subr.bf16.mxu1 %v4238_v0 }
 0x554   :  { %3787 = vmatpush3.bf16.msra.mxu1 %v3786_v2 }
 0x555   :  { %3788 = vmatprep.subr.bf16.mxu1 %v4238_v0 }
 0x558   :  { %3790 = vmatpush3.bf16.msra.mxu1 %v3789_v61  ;;  %v1614_v61 = vld [vmem:[#allocation11 + $0x2a0] sm:$0xff] }
 0x559   :  { %3791 = vmatprep.subr.bf16.mxu1 %v4238_v0  ;;  %v3869_v12 = vpack.c.bf16 %v1615_v62, %v1614_v61  ;;  %v1854_v62 = vld [vmem:[#allocation11 + $0x350] sm:$0xff] }
 0x55c   :  { %3793 = vmatpush3.bf16.msra.mxu1 %v3792_v13  ;;  %v1616_v13 = vld [vmem:[#allocation11 + $0x2b0] sm:$0xff] }
 0x55d   :  { %3794 = vmatprep.subr.bf16.mxu1 %v4238_v0  ;;  %v3872_v17 = vpack.c.bf16 %v1617_v16, %v1616_v13  ;;  %v1856_v16 = vld [vmem:[#allocation11 + $0x360] sm:$0xff] }
 0x560   :  { %3796 = vmatpush3.bf16.msra.mxu1 %v3795_v19  ;;  %v1618_v19 = vld [vmem:[#allocation11 + $0x2c0] sm:$0xff] }
 0x561   :  { %3797 = vmatprep.subr.bf16.mxu1 %v4238_v0  ;;  %v3875_v23 = vpack.c.bf16 %v1619_v20, %v1618_v19  ;;  %v1858_v19 = vld [vmem:[#allocation11 + $0x370] sm:$0xff] }
 0x564   :  { %3799 = vmatpush3.bf16.msra.mxu1 %v3798_v24  ;;  %v1620_v24 = vld [vmem:[#allocation11 + $0x2d0] sm:$0xff] }
 0x565   :  { %3800 = vmatprep.subr.bf16.mxu1 %v4238_v0 }
 0x5e2   :  { %v990_v29 = vpop.f32.mrb[8].mxu1 }
 0x5e3   :  { %v4662_v30 = vadd.f32 %v990_v29, %v4586_v43  ;;  %v3023_v32 = vpop.f32.mrb[9].mxu1  ;;  %v216_v43 = vadd.f32 %v4483_v51, %v4510_v6  ;;  %v1390_v29 = vld [vmem:[#allocation11 + $0x270] sm:$0xff] }
 0x5e4   :  { %v3801_v32 = vpack.c.bf16 %v1389_v26, %v1388_v25  ;;  %v1621_v25 = vld [vmem:[#allocation11 + $0x2d8] sm:$0xff] }
 0x5e5   :  { %v3878_v26 = vpack.c.bf16 %v1621_v25, %v1620_v24 }
 0x5e6   :  { %3802 = vmatpush3.bf16.msra.mxu1 %v3801_v32  ;;  %v1623_v32 = vld [vmem:[#allocation11 + $0x2e8] sm:$0xff] }
 0x5e7   :  { %3803 = vmatprep.subr.bf16.mxu1 %v4238_v0 }
 0x602   :  { %v2474_v33 = vpop.f32.mrb[10].mxu1 }
 0x603   :  { %v2475_v35 = vpop.f32.mrb[11].mxu1 }
 0x604   :  { %v2476_v36 = vadd.f32 %v2475_v35, %v2474_v33  ;;  %v1391_v33 = vld [vmem:[#allocation11 + $0x278] sm:$0xff] }
 0x605   :  { %v3804_v35 = vpack.c.bf16 %v1391_v33, %v1390_v29  ;;  %v1622_v29 = vld [vmem:[#allocation11 + $0x2e0] sm:$0xff]  ;;  %v1624_v33 = vld [vmem:[#allocation11 + $0x2f0] sm:$0xff] }
 0x606   :  { %v1139_v63 = vadd.f32 %v2476_v36, %v4524_v37 }
 0x607   :  { %3805 = vmatpush3.bf16.msra.mxu1 %v3804_v35  ;;  %v3881_v35 = vpack.c.bf16 %v1623_v32, %v1622_v29 }
 0x608   :  { %4071 = vtanh.f32 %v1139_v63  ;;  %3831 = vmatprep.subr.bf16.mxu1 %v4409_v53 }
 0x612   :  { %v4072_v57 = vpop.eup %4071 }
 0x613   :  { %3092 = vmatmul.mubr.f32.vlgmr.msra.gmra.mrb[18].mxu0 %v4072_v57 }
 0x614   :  { %3753 = vmatpush3.bf16.msra.mxu0 %v4412_v59  ;;  %1367 = vmatprep.mubr.f32.mxu0 %v4072_v57 }
 0x615   :  { %3755 = vmatprep.subr.bf16.mxu0 %v4416_v60 }
 0x618   :  { %3757 = vmatpush3.bf16.msra.mxu0 %v4421_v3 }
 0x619   :  { %3759 = vmatprep.subr.bf16.mxu0 %v4425_v4 }
 0x61c   :  { %3761 = vmatpush3.bf16.msra.mxu0 %v4431_v10 }
 0x61d   :  { %3763 = vmatprep.subr.bf16.mxu0 %v4435_v11 }
 0x620   :  { %3765 = vmatpush3.bf16.msra.mxu0 %v4439_v14 }
 0x621   :  { %3767 = vmatprep.subr.bf16.mxu0 %v4454_v18 }
 0x622   :  { %v1297_v38 = vpop.f32.mrb[12].mxu1 }
 0x623   :  { %v1301_v42 = vadd.f32 %v1297_v38, %v216_v43  ;;  %v3128_v44 = vpop.f32.mrb[13].mxu1 }
 0x624   :  { %3769 = vmatpush3.bf16.msra.mxu0 %v4456_v22 }
 0x625   :  { %3771 = vmatprep.subr.bf16.mxu0 %v4460_v27  ;;  %4073 = vtanh.f32 %v1301_v42 }
 0x628   :  { %3773 = vmatpush3.bf16.msra.mxu0 %v4462_v31 }
 0x629   :  { %3775 = vmatprep.subr.bf16.mxu0 %v4466_v39 }
 0x62c   :  { %3777 = vmatpush3.bf16.msra.mxu0 %v4468_v41 }
 0x62d   :  { %3779 = vmatprep.subr.bf16.mxu0 %v4471_v49 }
 0x62f   :  { %v4074_v6 = vpop.eup %4073 }
 0x630   :  { %3781 = vmatpush3.bf16.msra.mxu0 %v4474_v50 }
 0x631   :  { %3806 = vmatprep.subr.bf16.mxu0 %v4238_v0 }
 0x633   :  { %1368 = vmatmul.mubr.f32.vlgmr.msra.gmra.mrb[20].mxu0 %v4074_v6 }
 0x634   :  { %3808 = vmatpush3.bf16.msra.mxu0 %v4379_v9  ;;  %3196 = vmatprep.mubr.msk.f32.mxu0 %vm4239_vm0, %v4240_v1 }
 0x635   :  { %3809 = vmatprep.subr.bf16.mxu0 %v4238_v0 }
 0x638   :  { %3811 = vmatpush3.bf16.msra.mxu0 %v4382_v15 }
 0x639   :  { %3812 = vmatprep.subr.bf16.mxu0 %v4238_v0 }
 0x63c   :  { %3814 = vmatpush3.bf16.msra.mxu0 %v4386_v21 }
 0x63d   :  { %3815 = vmatprep.subr.bf16.mxu0 %v4238_v0 }
 0x640   :  { %3817 = vmatpush3.bf16.msra.mxu0 %v4390_v28 }
 0x641   :  { %3818 = vmatprep.subr.bf16.mxu0 %v4238_v0 }
 0x644   :  { %3820 = vmatpush3.bf16.msra.mxu0 %v4394_v34 }
 0x645   :  { %3821 = vmatprep.subr.bf16.mxu0 %v4238_v0 }
 0x648   :  { %3823 = vmatpush3.bf16.msra.mxu0 %v4398_v40 }
 0x649   :  { %3824 = vmatprep.subr.bf16.mxu0 %v4238_v0 }
 0x64c   :  { %3826 = vmatpush3.bf16.msra.mxu0 %v4402_v46 }
 0x64d   :  { %3827 = vmatprep.subr.bf16.mxu0 %v4238_v0 }
 0x650   :  { %3829 = vmatpush3.bf16.msra.mxu0 %v4406_v52 }
 0x651   :  { %3862 = vmatprep.subr.bf16.mxu0 %v4238_v0 }
 0x653   :  { %3197 = vmatmul.mubr.f32.vlgmr.msra.gmra.mrb[22].mxu0 %v4074_v6 }
 0x654   :  { %3231 = vmatprep.mubr.msk.f32.mxu0 %vm4239_vm0, %v4240_v1 }
 0x6e6   :  { %v1224_v36 = vpop.f32.mrb[18].mxu0 }
 0x6e7   :  { %v4712_v63 = vadd.f32 %v1224_v36, %v4662_v30  ;;  %v3093_v57 = vpop.f32.mrb[19].mxu0  ;;  %v221_v30 = vadd.f32 %v4508_v5, %v4483_v51  ;;  %v1610_v5 = vld [vmem:[#allocation11 + $0x280] sm:$0xff]  ;;  %v1625_v36 = vld [vmem:[#allocation11 + $0x2f8] sm:$0xff] }
 0x6e8   :  { %v3863_v2 = vpack.c.bf16 %v1611_v55, %v1610_v5  ;;  %v3884_v57 = vpack.c.bf16 %v1625_v36, %v1624_v33  ;;  %v1849_v55 = vld [vmem:[#allocation11 + $0x328] sm:$0xff]  ;;  %v4822_v36 = vld [vmem:[%s4871_s5] ss:$0 sm:$0xff] }
 0x6ea   :  { %3864 = vmatpush3.bf16.msra.mxu0 %v3863_v2  ;;  %v1851_v2 = vld [vmem:[#allocation11 + $0x338] sm:$0xff] }
 0x6eb   :  { %3865 = vmatprep.subr.bf16.mxu0 %v4238_v0 }
 0x6ee   :  { %3867 = vmatpush3.bf16.msra.mxu0 %v3866_v58  ;;  %v1853_v58 = vld [vmem:[#allocation11 + $0x348] sm:$0xff] }
 0x6ef   :  { %3868 = vmatprep.subr.bf16.mxu0 %v4238_v0 }
 0x6f2   :  { %3870 = vmatpush3.bf16.msra.mxu0 %v3869_v12  ;;  %v1855_v12 = vld [vmem:[#allocation11 + $0x358] sm:$0xff] }
 0x6f3   :  { %3871 = vmatprep.subr.bf16.mxu0 %v4238_v0  ;;  %v3958_v13 = vpack.c.bf16 %v1855_v12, %v1854_v62 }
 0x6f6   :  { %3873 = vmatpush3.bf16.msra.mxu0 %v3872_v17  ;;  %v1857_v17 = vld [vmem:[#allocation11 + $0x368] sm:$0xff] }
 0x6f7   :  { %3874 = vmatprep.subr.bf16.mxu0 %v4238_v0  ;;  %v3961_v20 = vpack.c.bf16 %v1857_v17, %v1856_v16 }
 0x6fa   :  { %3876 = vmatpush3.bf16.msra.mxu0 %v3875_v23  ;;  %v1859_v23 = vld [vmem:[#allocation11 + $0x378] sm:$0xff] }
 0x6fb   :  { %3877 = vmatprep.subr.bf16.mxu0 %v4238_v0  ;;  %v3964_v24 = vpack.c.bf16 %v1859_v23, %v1858_v19 }
 0x6fe   :  { %3879 = vmatpush3.bf16.msra.mxu0 %v3878_v26 }
 0x6ff   :  { %3880 = vmatprep.subr.bf16.mxu0 %v4238_v0 }
 0x702   :  { %3882 = vmatpush3.bf16.msra.mxu0 %v3881_v35 }
 0x703   :  { %3883 = vmatprep.subr.bf16.mxu0 %v4238_v0 }
 0x706   :  { %v2543_v43 = vpop.f32.mrb[20].mxu0  ;;  %3885 = vmatpush3.bf16.msra.mxu0 %v3884_v57 }
 0x707   :  { %v2544_v38 = vpop.f32.mrb[21].mxu0  ;;  %3911 = vmatprep.subr.bf16.mxu0 %v4409_v53 }
 0x708   :  { %v2545_v42 = vadd.f32 %v2544_v38, %v2543_v43 }
 0x70a   :  { %v1373_v44 = vadd.f32 %v2545_v42, %v4524_v37 }
 0x70c   :  { %4075 = vtanh.f32 %v1373_v44 }
 0x716   :  { %v4076_v6 = vpop.eup %4075 }
 0x717   :  { %3162 = vmatmul.mubr.f32.vlgmr.msra.gmra.mrb[14].mxu1 %v4076_v6 }
 0x718   :  { %3833 = vmatpush3.bf16.msra.mxu1 %v4412_v59  ;;  %1601 = vmatprep.mubr.f32.mxu1 %v4076_v6 }
 0x719   :  { %3835 = vmatprep.subr.bf16.mxu1 %v4416_v60 }
 0x71c   :  { %3837 = vmatpush3.bf16.msra.mxu1 %v4421_v3 }
 0x71d   :  { %3839 = vmatprep.subr.bf16.mxu1 %v4425_v4 }
 0x720   :  { %3841 = vmatpush3.bf16.msra.mxu1 %v4431_v10 }
 0x721   :  { %3843 = vmatprep.subr.bf16.mxu1 %v4435_v11 }
 0x724   :  { %3845 = vmatpush3.bf16.msra.mxu1 %v4439_v14 }
 0x725   :  { %3847 = vmatprep.subr.bf16.mxu1 %v4454_v18 }
 0x726   :  { %v1531_v45 = vpop.f32.mrb[22].mxu0 }
 0x727   :  { %v1535_v47 = vadd.f32 %v1531_v45, %v221_v30  ;;  %v3198_v48 = vpop.f32.mrb[23].mxu0 }
 0x728   :  { %3849 = vmatpush3.bf16.msra.mxu1 %v4456_v22 }
 0x729   :  { %3851 = vmatprep.subr.bf16.mxu1 %v4460_v27  ;;  %4077 = vtanh.f32 %v1535_v47 }
 0x72c   :  { %3853 = vmatpush3.bf16.msra.mxu1 %v4462_v31 }
 0x72d   :  { %3855 = vmatprep.subr.bf16.mxu1 %v4466_v39 }
 0x730   :  { %3857 = vmatpush3.bf16.msra.mxu1 %v4468_v41 }
 0x731   :  { %3859 = vmatprep.subr.bf16.mxu1 %v4471_v49 }
 0x733   :  { %v4078_v51 = vpop.eup %4077 }
 0x734   :  { %3861 = vmatpush3.bf16.msra.mxu1 %v4474_v50 }
 0x735   :  { %3886 = vmatprep.subr.bf16.mxu1 %v4238_v0 }
 0x737   :  { %1602 = vmatmul.mubr.f32.vlgmr.msra.gmra.mrb[16].mxu1 %v4078_v51 }
 0x738   :  { %3888 = vmatpush3.bf16.msra.mxu1 %v4379_v9  ;;  %3266 = vmatprep.mubr.msk.f32.mxu1 %vm4239_vm0, %v4240_v1 }
 0x739   :  { %3889 = vmatprep.subr.bf16.mxu1 %v4238_v0 }
 0x73c   :  { %3891 = vmatpush3.bf16.msra.mxu1 %v4382_v15 }
 0x73d   :  { %3892 = vmatprep.subr.bf16.mxu1 %v4238_v0 }
 0x740   :  { %3894 = vmatpush3.bf16.msra.mxu1 %v4386_v21 }
 0x741   :  { %3895 = vmatprep.subr.bf16.mxu1 %v4238_v0 }
 0x744   :  { %3897 = vmatpush3.bf16.msra.mxu1 %v4390_v28 }
 0x745   :  { %3898 = vmatprep.subr.bf16.mxu1 %v4238_v0 }
 0x748   :  { %3900 = vmatpush3.bf16.msra.mxu1 %v4394_v34 }
 0x749   :  { %3901 = vmatprep.subr.bf16.mxu1 %v4238_v0 }
 0x74c   :  { %3903 = vmatpush3.bf16.msra.mxu1 %v4398_v40 }
 0x74d   :  { %3904 = vmatprep.subr.bf16.mxu1 %v4238_v0 }
 0x750   :  { %3906 = vmatpush3.bf16.msra.mxu1 %v4402_v46 }
 0x751   :  { %3907 = vmatprep.subr.bf16.mxu1 %v4238_v0 }
 0x754   :  { %3909 = vmatpush3.bf16.msra.mxu1 %v4406_v52 }
 0x755   :  { %3942 = vmatprep.subr.bf16.mxu1 %v4238_v0 }
 0x757   :  { %3267 = vmatmul.mubr.f32.vlgmr.msra.gmra.mrb[18].mxu1 %v4078_v51 }
 0x758   :  { %3301 = vmatprep.mubr.msk.f32.mxu1 %vm4239_vm0, %v4240_v1 }
 0x7ea   :  { %v1458_v43 = vpop.f32.mrb[14].mxu1 }
 0x7eb   :  { %v4762_v38 = vadd.f32 %v1458_v43, %v4712_v63  ;;  %v3163_v42 = vpop.f32.mrb[15].mxu1 }
 0x80a   :  { %v2612_v44 = vpop.f32.mrb[16].mxu1 }
 0x80b   :  { %v2613_v6 = vpop.f32.mrb[17].mxu1 }
 0x80c   :  { %v2614_v30 = vadd.f32 %v2613_v6, %v2612_v44  ;;  %v2088_v6 = vld [vmem:[#allocation11 + $0x3d0] sm:$0xff] }
 0x80e   :  { %v1607_v45 = vadd.f32 %v2614_v30, %v4524_v37  ;;  %v4775_v37 = vld [vmem:[%s4869_s3] ss:$0 sm:$0xff]  ;;  %v2089_v30 = vld [vmem:[#allocation11 + $0x3d8] sm:$0xff] }
 0x80f   :  { %v226_v63 = vadd.f32 %v4775_v37, %v4514_v8 }
 0x810   :  { %4079 = vtanh.f32 %v1607_v45  ;;  %v4038_v45 = vpack.c.bf16 %v2089_v30, %v2088_v6 }
 0x81a   :  { %v4080_v47 = vpop.eup %4079 }
 0x81b   :  { %3232 = vmatmul.mubr.f32.vlgmr.msra.gmra.mrb[24].mxu0 %v4080_v47 }
 0x81c   :  { %3913 = vmatpush3.bf16.msra.mxu0 %v4412_v59  ;;  %1835 = vmatprep.mubr.f32.mxu0 %v4080_v47  ;;  %v2090_v47 = vld [vmem:[#allocation11 + $0x3e0] sm:$0xff] }
 0x81d   :  { %3915 = vmatprep.subr.bf16.mxu0 %v4416_v60 }
 0x820   :  { %3917 = vmatpush3.bf16.msra.mxu0 %v4421_v3 }
 0x821   :  { %3919 = vmatprep.subr.bf16.mxu0 %v4425_v4 }
 0x824   :  { %3921 = vmatpush3.bf16.msra.mxu0 %v4431_v10 }
 0x825   :  { %3923 = vmatprep.subr.bf16.mxu0 %v4435_v11 }
 0x828   :  { %3925 = vmatpush3.bf16.msra.mxu0 %v4439_v14 }
 0x829   :  { %3927 = vmatprep.subr.bf16.mxu0 %v4454_v18 }
 0x82a   :  { %v1765_v48 = vpop.f32.mrb[18].mxu1 }
 0x82b   :  { %v1769_v51 = vadd.f32 %v1765_v48, %v226_v63  ;;  %v3268_v5 = vpop.f32.mrb[19].mxu1  ;;  %v2092_v48 = vld [vmem:[#allocation11 + $0x3f0] sm:$0xff] }
 0x82c   :  { %3929 = vmatpush3.bf16.msra.mxu0 %v4456_v22 }
 0x82d   :  { %3931 = vmatprep.subr.bf16.mxu0 %v4460_v27  ;;  %4081 = vtanh.f32 %v1769_v51  ;;  %v2093_v51 = vld [vmem:[#allocation11 + $0x3f8] sm:$0xff] }
 0x82e   :  { %v4044_v5 = vpack.c.bf16 %v2093_v51, %v2092_v48 }
 0x830   :  { %3933 = vmatpush3.bf16.msra.mxu0 %v4462_v31 }
 0x831   :  { %3935 = vmatprep.subr.bf16.mxu0 %v4466_v39 }
 0x834   :  { %3937 = vmatpush3.bf16.msra.mxu0 %v4468_v41 }
 0x835   :  { %3939 = vmatprep.subr.bf16.mxu0 %v4471_v49 }
 0x837   :  { %v4082_v8 = vpop.eup %4081 }
 0x838   :  { %3941 = vmatpush3.bf16.msra.mxu0 %v4474_v50 }
 0x839   :  { %3966 = vmatprep.subr.bf16.mxu0 %v4238_v0 }
 0x83b   :  { %1836 = vmatmul.mubr.f32.vlgmr.msra.gmra.mrb[26].mxu0 %v4082_v8 }
 0x83c   :  { %3968 = vmatpush3.bf16.msra.mxu0 %v4379_v9  ;;  %3336 = vmatprep.mubr.msk.f32.mxu0 %vm4239_vm0, %v4240_v1  ;;  %v1844_v9 = vld [vmem:[#allocation11 + $0x300] sm:$0xff] }
 0x83d   :  { %3969 = vmatprep.subr.bf16.mxu0 %v4238_v0 }
 0x840   :  { %3971 = vmatpush3.bf16.msra.mxu0 %v4382_v15  ;;  %v1845_v15 = vld [vmem:[#allocation11 + $0x308] sm:$0xff] }
 0x841   :  { %3972 = vmatprep.subr.bf16.mxu0 %v4238_v0 }
 0x844   :  { %3974 = vmatpush3.bf16.msra.mxu0 %v4386_v21  ;;  %v1846_v21 = vld [vmem:[#allocation11 + $0x310] sm:$0xff] }
 0x845   :  { %3975 = vmatprep.subr.bf16.mxu0 %v4238_v0 }
 0x848   :  { %3977 = vmatpush3.bf16.msra.mxu0 %v4390_v28  ;;  %v3943_v28 = vpack.c.bf16 %v1845_v15, %v1844_v9 }
 0x849   :  { %3978 = vmatprep.subr.bf16.mxu0 %v4238_v0 }
 0x84a   :  { %3944 = vmatpush3.bf16.msra.mxu1 %v3943_v28 }
 0x84b   :  { %3945 = vmatprep.subr.bf16.mxu1 %v4238_v0 }
 0x84c   :  { %3980 = vmatpush3.bf16.msra.mxu0 %v4394_v34  ;;  %v1847_v34 = vld [vmem:[#allocation11 + $0x318] sm:$0xff] }
 0x84d   :  { %3981 = vmatprep.subr.bf16.mxu0 %v4238_v0 }
 0x850   :  { %3983 = vmatpush3.bf16.msra.mxu0 %v4398_v40  ;;  %v3946_v40 = vpack.c.bf16 %v1847_v34, %v1846_v21 }
 0x851   :  { %3984 = vmatprep.subr.bf16.mxu0 %v4238_v0 }
 0x852   :  { %3947 = vmatpush3.bf16.msra.mxu1 %v3946_v40 }
 0x853   :  { %3948 = vmatprep.subr.bf16.mxu1 %v4238_v0 }
 0x854   :  { %3986 = vmatpush3.bf16.msra.mxu0 %v4402_v46  ;;  %v1848_v46 = vld [vmem:[#allocation11 + $0x320] sm:$0xff] }
 0x855   :  { %3987 = vmatprep.subr.bf16.mxu0 %v4238_v0  ;;  %v3949_v54 = vpack.c.bf16 %v1849_v55, %v1848_v46 }
 0x857   :  { %3950 = vmatpush3.bf16.msra.mxu1 %v3949_v54  ;;  %v2193_v54 = vld [vmem:[%s4873_s7] ss:$0 sm:$0xff] }
 0x858   :  { %3989 = vmatpush3.bf16.msra.mxu0 %v4406_v52  ;;  %v1850_v52 = vld [vmem:[#allocation11 + $0x330] sm:$0xff]  ;;  %3951 = vmatprep.subr.bf16.mxu1 %v4238_v0 }
 0x859   :  { %4022 = vmatprep.subr.bf16.mxu0 %v4238_v0  ;;  %v3952_v56 = vpack.c.bf16 %v1851_v2, %v1850_v52 }
 0x85b   :  { %3337 = vmatmul.mubr.f32.vlgmr.msra.gmra.mrb[28].mxu0 %v4082_v8  ;;  %3953 = vmatpush3.bf16.msra.mxu1 %v3952_v56 }
 0x85c   :  { %3371 = vmatprep.mubr.msk.f32.mxu0 %vm4239_vm0, %v4240_v1  ;;  %3954 = vmatprep.subr.bf16.mxu1 %v4238_v0  ;;  %v1852_v1 = vld [vmem:[#allocation11 + $0x340] sm:$0xff] }
 0x85d   :  { %v3955_v61 = vpack.c.bf16 %v1853_v58, %v1852_v1 }
 0x85f   :  { %3956 = vmatpush3.bf16.msra.mxu1 %v3955_v61 }
 0x860   :  { %3957 = vmatprep.subr.bf16.mxu1 %v4238_v0 }
 0x863   :  { %3959 = vmatpush3.bf16.msra.mxu1 %v3958_v13 }
 0x864   :  { %3960 = vmatprep.subr.bf16.mxu1 %v4238_v0 }
 0x867   :  { %3962 = vmatpush3.bf16.msra.mxu1 %v3961_v20 }
 0x868   :  { %3963 = vmatprep.subr.bf16.mxu1 %v4238_v0 }
 0x86b   :  { %3965 = vmatpush3.bf16.msra.mxu1 %v3964_v24 }
 0x86c   :  { %3991 = vmatprep.subr.bf16.mxu1 %v4409_v53  ;;  %v231_v53 = vadd.f32 %v4775_v37, %v4512_v7  ;;  %v2087_v7 = vld [vmem:[#allocation11 + $0x3c8] sm:$0xff] }
 0x86d   :  { %v2091_v37 = vld [vmem:[#allocation11 + $0x3e8] sm:$0xff] }
 0x86e   :  { %v4041_v63 = vpack.c.bf16 %v2091_v37, %v2090_v47 }
 0x8ee   :  { %v1692_v25 = vpop.f32.mrb[24].mxu0 }
 0x8ef   :  { %v4817_v26 = vadd.f32 %v1692_v25, %v4762_v38  ;;  %v3233_v29 = vpop.f32.mrb[25].mxu0 }
 0x90e   :  { %v2681_v32 = vpop.f32.mrb[26].mxu0 }
 0x90f   :  { %v2682_v33 = vpop.f32.mrb[27].mxu0 }
 0x910   :  { %v2683_v35 = vadd.f32 %v2682_v33, %v2681_v32 }
 0x912   :  { %v1841_v57 = vadd.f32 %v4822_v36, %v2683_v35 }
 0x914   :  { %4083 = vtanh.f32 %v1841_v57 }
 0x91e   :  { %v4084_v43 = vpop.eup %4083 }
 0x91f   :  { %3302 = vmatmul.mubr.f32.vlgmr.msra.gmra.mrb[20].mxu1 %v4084_v43 }
 0x920   :  { %3993 = vmatpush3.bf16.msra.mxu1 %v4412_v59  ;;  %2069 = vmatprep.mubr.f32.mxu1 %v4084_v43 }
 0x921   :  { %3995 = vmatprep.subr.bf16.mxu1 %v4416_v60 }
 0x924   :  { %3997 = vmatpush3.bf16.msra.mxu1 %v4421_v3  ;;  %v2078_v3 = vld [vmem:[#allocation11 + $0x380] sm:$0xff] }
 0x925   :  { %3999 = vmatprep.subr.bf16.mxu1 %v4425_v4  ;;  %v2079_v4 = vld [vmem:[#allocation11 + $0x388] sm:$0xff] }
 0x928   :  { %4001 = vmatpush3.bf16.msra.mxu1 %v4431_v10  ;;  %v2080_v10 = vld [vmem:[#allocation11 + $0x390] sm:$0xff] }
 0x929   :  { %4003 = vmatprep.subr.bf16.mxu1 %v4435_v11  ;;  %v4023_v11 = vpack.c.bf16 %v2079_v4, %v2078_v3 }
 0x92b   :  { %4024 = vmatpush3.bf16.msra.mxu0 %v4023_v11 }
 0x92c   :  { %4005 = vmatpush3.bf16.msra.mxu1 %v4439_v14  ;;  %v2081_v14 = vld [vmem:[#allocation11 + $0x398] sm:$0xff]  ;;  %4025 = vmatprep.subr.bf16.mxu0 %v4238_v0 }
 0x92d   :  { %4007 = vmatprep.subr.bf16.mxu1 %v4454_v18  ;;  %v4026_v18 = vpack.c.bf16 %v2081_v14, %v2080_v10 }
 0x92e   :  { %v1999_v38 = vpop.f32.mrb[28].mxu0 }
 0x92f   :  { %v2003_v59 = vadd.f32 %v1999_v38, %v231_v53  ;;  %v3338_v42 = vpop.f32.mrb[29].mxu0  ;;  %4027 = vmatpush3.bf16.msra.mxu0 %v4026_v18 }
 0x930   :  { %4009 = vmatpush3.bf16.msra.mxu1 %v4456_v22  ;;  %v2082_v22 = vld [vmem:[#allocation11 + $0x3a0] sm:$0xff]  ;;  %4028 = vmatprep.subr.bf16.mxu0 %v4238_v0 }
 0x931   :  { %4011 = vmatprep.subr.bf16.mxu1 %v4460_v27  ;;  %4085 = vtanh.f32 %v2003_v59  ;;  %v2083_v27 = vld [vmem:[#allocation11 + $0x3a8] sm:$0xff] }
 0x934   :  { %4013 = vmatpush3.bf16.msra.mxu1 %v4462_v31  ;;  %v4029_v31 = vpack.c.bf16 %v2083_v27, %v2082_v22 }
 0x935   :  { %4015 = vmatprep.subr.bf16.mxu1 %v4466_v39  ;;  %v2084_v39 = vld [vmem:[#allocation11 + $0x3b0] sm:$0xff] }
 0x936   :  { %4030 = vmatpush3.bf16.msra.mxu0 %v4029_v31 }
 0x937   :  { %4031 = vmatprep.subr.bf16.mxu0 %v4238_v0 }
 0x938   :  { %4017 = vmatpush3.bf16.msra.mxu1 %v4468_v41  ;;  %v2085_v41 = vld [vmem:[#allocation11 + $0x3b8] sm:$0xff] }
 0x939   :  { %4019 = vmatprep.subr.bf16.mxu1 %v4471_v49  ;;  %v4032_v49 = vpack.c.bf16 %v2085_v41, %v2084_v39 }
 0x93b   :  { %v4086_v60 = vpop.eup %4085  ;;  %4033 = vmatpush3.bf16.msra.mxu0 %v4032_v49 }
 0x93c   :  { %4021 = vmatpush3.bf16.msra.mxu1 %v4474_v50  ;;  %4034 = vmatprep.subr.bf16.mxu0 %v4238_v0  ;;  %v2086_v50 = vld [vmem:[#allocation11 + $0x3c0] sm:$0xff] }
 0x93d   :  { %v4035_v44 = vpack.c.bf16 %v2087_v7, %v2086_v50 }
 0x93f   :  { %2070 = vmatmul.mubr.f32.vlgmr.msra.gmra.mrb[22].mxu1 %v4086_v60  ;;  %4036 = vmatpush3.bf16.msra.mxu0 %v4035_v44 }
 0x940   :  { %4037 = vmatprep.subr.bf16.mxu0 %v4238_v0 }
 0x943   :  { %4039 = vmatpush3.bf16.msra.mxu0 %v4038_v45 }
 0x944   :  { %4040 = vmatprep.subr.bf16.mxu0 %v4238_v0 }
 0x947   :  { %4042 = vmatpush3.bf16.msra.mxu0 %v4041_v63 }
 0x948   :  { %4043 = vmatprep.subr.bf16.mxu0 %v4238_v0 }
 0x94b   :  { %4045 = vmatpush3.bf16.msra.mxu0 %v4044_v5 }
 0x9f2   :  { %v1926_v8 = vpop.f32.mrb[20].mxu1 }
 0x9f3   :  { %v1930_v9 = vadd.f32 %v1926_v8, %v4817_v26  ;;  %v3303_v15 = vpop.f32.mrb[21].mxu1 }
 0xa12   :  { %v2750_v21 = vpop.f32.mrb[22].mxu1 }
 0xa13   :  { %v2751_v28 = vpop.f32.mrb[23].mxu1 }
 0xa14   :  { %v2752_v34 = vadd.f32 %v2751_v28, %v2750_v21 }
 0xa16   :  { %v2075_v40 = vadd.f32 %v4822_v36, %v2752_v34 }
 0xa18   :  { %4087 = vtanh.f32 %v2075_v40 }
 0xa22   :  { %v4088_v46 = vpop.eup %4087 }
 0xa23   :  { %3372 = vmatmul.mubr.f32.vlgmr.msra.gmra.mrb[30].mxu0 %v4088_v46 }
 0xaf6   :  { %v2160_v55 = vpop.f32.mrb[30].mxu0 }
 0xaf7   :  { %v2164_v0 = vadd.f32 %v2160_v55, %v1930_v9  ;;  %v3373_v52 = vpop.f32.mrb[31].mxu0 }
 0xaf9   :  { %v2172_v2 = vadd.f32 %v2193_v54, %v2164_v0 }
 0xafb   :  { %2173 = vst [vmem:[#allocation12] sm:$0xff] %v2172_v2 }
 0xafc   :  { %4212 = shalt.err (!%p4209_p2)
}
 0xafd   :  { %s4213_s0 = scalar_lea.hbm %s4874_s8, 128 }
 0xafe   :  { %p4214_p3 = scmp.ne.s32.totalorder %s4874_s8, %s4213_s0  ;;  %p4217_p4 = scmp.lt.u32.totalorder %s4213_s0, %s4874_s8 }
 0xb00   :  { %p4219_p5 = pnand %p4217_p4, %p4214_p3 }
 0xb02   :  { %4222 = shalt.err (!%p4219_p5)
}
 0xb03   :  { %2183 = dma.vmem_to_hbm [thread:$0]  %s2181_s27, 128, %s4874_s8, [#allocation5]  }
 0xb04   :  { %4229 = dma.done.wait [#allocation5], 128  }
 0xb05   :  { %4230 = vsyncadd [#allocation5], 4294967168 }
 0xb06   :  { %2187 = vsyncpa [#allocation4], 1 }
 0xb07   :  { %2188 = vsyncpa [#allocation7], 1 }
 0xb08   :  { %2189 = vsyncpa [#allocation10], 1 }
 0xb09   :  { %2190 = vsyncpa [#allocation5], 1 }

</bundles_post_ra>
